<compile_context>
chip_gen: v7x
topology: tpu7x:2x2x1
jax: 0.10.0
libtpu: 0.0.40
codegen_flags: <defaults>
</compile_context>

<pallas_src>
import functools

import jax
import jax.numpy as jnp
from jax.experimental import pallas as pl
from jax.experimental.pallas import tpu as pltpu

# Logical (PyTorch) sizes
IN_F = 328
HID_F = 1000
OUT_F = 500

# Padded (TPU lane-aligned) sizes
IN_P = 384    # 3 * 128
HID_P = 1024  # 8 * 128
OUT_P = 512   # 4 * 128

TM_MAX = 256  # max batch-tile rows per grid step


def _round_up(n, m):
    return ((n + m - 1) // m) * m


def dnn_kernel(x_ref, w1_ref, b1_ref, w2_ref, b2_ref, o_ref):
    # fc1: (TM, IN_P)bf16 @ (IN_P, HID_P)bf16 -> f32 acc, bias add in f32.
    h = jnp.dot(x_ref[...], w1_ref[...], preferred_element_type=jnp.float32)
    h = h + b1_ref[...]
    # fc2: cast hidden to bf16 for the MXU, accumulate in f32, bias add in f32.
    out = jnp.dot(h.astype(jnp.bfloat16), w2_ref[...],
                  preferred_element_type=jnp.float32)
    out = out + b2_ref[...]
    o_ref[...] = out.astype(o_ref.dtype)


def prepare_params(w1, b1, w2, b2):
    """Pad + cast parameters ONCE (weights -> bf16, biases stay f32).

    Weights are stored as (in_features, out_features) so the kernel computes
    x @ W + b, identical to PyTorch's x @ W_pt.T + b.
    """
    w1p = jnp.zeros((IN_P, HID_P), jnp.bfloat16).at[:IN_F, :HID_F].set(
        w1.astype(jnp.bfloat16))
    b1p = jnp.zeros((1, HID_P), jnp.float32).at[0, :HID_F].set(
        b1.astype(jnp.float32))
    w2p = jnp.zeros((HID_P, OUT_P), jnp.bfloat16).at[:HID_F, :OUT_F].set(
        w2.astype(jnp.bfloat16))
    b2p = jnp.zeros((1, OUT_P), jnp.float32).at[0, :OUT_F].set(
        b2.astype(jnp.float32))
    return w1p, b1p, w2p, b2p


@jax.jit
def dnn_forward(x, params):
    """x: (B, 328) (or any (B, ...) flattening to 328 features).

    params: output of prepare_params(). Returns (B, 500) f32, matching
    PyTorch DNN.forward semantics.
    """
    w1p, b1p, w2p, b2p = params
    B = x.shape[0]
    x = x.reshape(B, -1)  # x.view(x.size(0), -1)
    assert x.shape[1] == IN_F, x.shape

    # Batch tiling: small batches -> one tile; large batches -> TM_MAX tiles.
    tm = min(TM_MAX, _round_up(max(B, 8), 8))
    b_pad = _round_up(max(B, 8), tm)
    grid = (b_pad // tm,)

    # Only x needs per-call padding (zero rows/features keep the math exact);
    # cast to bf16 in the wrapper so the kernel DMAs half the bytes.
    xp = jnp.zeros((b_pad, IN_P), jnp.bfloat16).at[:B, :IN_F].set(
        x.astype(jnp.bfloat16))

    flops = 2 * b_pad * (IN_P * HID_P + HID_P * OUT_P)
    bytes_accessed = (xp.size * 2 + w1p.size * 2 + w2p.size * 2
                      + b1p.size * 4 + b2p.size * 4 + b_pad * OUT_P * 4)

    out_p = pl.pallas_call(
        dnn_kernel,
        out_shape=jax.ShapeDtypeStruct((b_pad, OUT_P), jnp.float32),
        grid=grid,
        in_specs=[
            pl.BlockSpec((tm, IN_P), lambda i: (i, 0)),      # x tile per step
            pl.BlockSpec((IN_P, HID_P), lambda i: (0, 0)),   # w1 resident
            pl.BlockSpec((1, HID_P), lambda i: (0, 0)),      # b1 resident
            pl.BlockSpec((HID_P, OUT_P), lambda i: (0, 0)),  # w2 resident
            pl.BlockSpec((1, OUT_P), lambda i: (0, 0)),      # b2 resident
        ],
        out_specs=pl.BlockSpec((tm, OUT_P), lambda i: (i, 0)),
        compiler_params=pltpu.CompilerParams(
            dimension_semantics=("parallel",)),
        cost_estimate=pl.CostEstimate(
            flops=flops, transcendentals=0, bytes_accessed=bytes_accessed),
    )(xp, w1p, b1p, w2p, b2p)

    return out_p[:B, :OUT_F]


def init_params(key):
    """Deterministic synthetic parameters with the shapes from DNN.__init__."""
    k1, k2, k3, k4 = jax.random.split(key, 4)
    # PyTorch Linear default init: U(-1/sqrt(fan_in), 1/sqrt(fan_in)).
    s1 = 1.0 / (IN_F ** 0.5)
    s2 = 1.0 / (HID_F ** 0.5)
    w1 = jax.random.uniform(k1, (IN_F, HID_F), jnp.float32, -s1, s1)
    b1 = jax.random.uniform(k2, (HID_F,), jnp.float32, -s1, s1)
    w2 = jax.random.uniform(k3, (HID_F, OUT_F), jnp.float32, -s2, s2)
    b2 = jax.random.uniform(k4, (OUT_F,), jnp.float32, -s2, s2)
    return w1, b1, w2, b2


if __name__ == "__main__":
    key = jax.random.PRNGKey(0)
    kx, kp = jax.random.split(key)

    B = 2
    x = jax.random.normal(kx, (B, IN_F), jnp.float32)
    w1, b1, w2, b2 = init_params(kp)

    params = prepare_params(w1, b1, w2, b2)  # padded + bf16, built once
    out = dnn_forward(x, params)
    out = jax.block_until_ready(out)

    # Reference check against plain f32 JAX (same math as PyTorch forward).
    ref = (x @ w1 + b1) @ w2 + b2
    assert out.shape == (B, OUT_F), out.shape
    assert jnp.allclose(out, ref, atol=2e-2, rtol=2e-2), "mismatch vs reference"

    print("KERNEL_OK")
</pallas_src>

<mosaic_0001>
module attributes {stable_mosaic.version = 11 : i64} {
  func.func @dnn_kernel(%arg0: i32, %arg1: memref<8x384xbf16, #tpu.memory_space<vmem>>, %arg2: memref<384x1024xbf16, #tpu.memory_space<vmem>>, %arg3: memref<1x1024xf32, #tpu.memory_space<vmem>>, %arg4: memref<1024x512xbf16, #tpu.memory_space<vmem>>, %arg5: memref<1x512xf32, #tpu.memory_space<vmem>>, %arg6: memref<8x512xf32, #tpu.memory_space<vmem>>) attributes {dimension_semantics = [#tpu.dimension_semantics<parallel>], iteration_bounds = array<i64: 1>, scalar_prefetch = 0 : i64, scratch_operands = 0 : i64, tpu.core_type = #tpu.core_type<tc>, window_params = [{transform_indices = @transform_0, window_bounds = array<i64: 8, 384>}, {pipeline_mode = #tpu.pipeline_mode<synchronous>, transform_indices = @transform_1, window_bounds = array<i64: 384, 1024>}, {pipeline_mode = #tpu.pipeline_mode<synchronous>, transform_indices = @transform_2, window_bounds = array<i64: 1, 1024>}, {pipeline_mode = #tpu.pipeline_mode<synchronous>, transform_indices = @transform_3, window_bounds = array<i64: 1024, 512>}, {pipeline_mode = #tpu.pipeline_mode<synchronous>, transform_indices = @transform_4, window_bounds = array<i64: 1, 512>}, {transform_indices = @transform_5, window_bounds = array<i64: 8, 512>}]} {
    %c0 = arith.constant 0 : index
    %c0_0 = arith.constant 0 : index
    %0 = vector.load %arg1[%c0, %c0_0] : memref<8x384xbf16, #tpu.memory_space<vmem>>, vector<8x384xbf16>
    %c0_1 = arith.constant 0 : index
    %c0_2 = arith.constant 0 : index
    %1 = vector.load %arg2[%c0_1, %c0_2] : memref<384x1024xbf16, #tpu.memory_space<vmem>>, vector<384x1024xbf16>
    %cst = arith.constant dense<0.000000e+00> : vector<8x1024xf32>
    %2 = tpu.matmul %0, %1, %cst {dimension_numbers = #tpu.dot_dimension_numbers<[1], [0], [0], [1], [0, 0, 1, 1], [], []>} : vector<8x384xbf16>, vector<384x1024xbf16>, vector<8x1024xf32> -> vector<8x1024xf32>
    %c0_3 = arith.constant 0 : index
    %c0_4 = arith.constant 0 : index
    %3 = vector.load %arg3[%c0_3, %c0_4] : memref<1x1024xf32, #tpu.memory_space<vmem>>, vector<1x1024xf32>
    %4 = vector.broadcast %3 : vector<1x1024xf32> to vector<8x1024xf32>
    %5 = arith.addf %2, %4 : vector<8x1024xf32>
    %6 = arith.truncf %5 : vector<8x1024xf32> to vector<8x1024xbf16>
    %c0_5 = arith.constant 0 : index
    %c0_6 = arith.constant 0 : index
    %7 = vector.load %arg4[%c0_5, %c0_6] : memref<1024x512xbf16, #tpu.memory_space<vmem>>, vector<1024x512xbf16>
    %cst_7 = arith.constant dense<0.000000e+00> : vector<8x512xf32>
    %8 = tpu.matmul %6, %7, %cst_7 {dimension_numbers = #tpu.dot_dimension_numbers<[1], [0], [0], [1], [0, 0, 1, 1], [], []>} : vector<8x1024xbf16>, vector<1024x512xbf16>, vector<8x512xf32> -> vector<8x512xf32>
    %c0_8 = arith.constant 0 : index
    %c0_9 = arith.constant 0 : index
    %9 = vector.load %arg5[%c0_8, %c0_9] : memref<1x512xf32, #tpu.memory_space<vmem>>, vector<1x512xf32>
    %10 = vector.broadcast %9 : vector<1x512xf32> to vector<8x512xf32>
    %11 = arith.addf %8, %10 : vector<8x512xf32>
    %c0_10 = arith.constant 0 : index
    %c0_11 = arith.constant 0 : index
    %12 = vector.load %arg6[%c0_10, %c0_11] : memref<8x512xf32, #tpu.memory_space<vmem>>, vector<8x512xf32>
    tpu.vector_store %arg6[%c0_10, %c0_11], %11 {strides = array<i32>} : memref<8x512xf32, #tpu.memory_space<vmem>>, vector<8x512xf32>,
    return
  }
  func.func @transform_0(%arg0: i32) -> (i32, i32) {
    %c0_i32 = arith.constant 0 : i32
    %c0_i32_0 = arith.constant 0 : i32
    return %arg0, %c0_i32 : i32, i32
  }
  func.func @transform_1(%arg0: i32) -> (i32, i32) {
    %c0_i32 = arith.constant 0 : i32
    %c0_i32_0 = arith.constant 0 : i32
    %c0_i32_1 = arith.constant 0 : i32
    return %c0_i32, %c0_i32_0 : i32, i32
  }
  func.func @transform_2(%arg0: i32) -> (i32, i32) {
    %c0_i32 = arith.constant 0 : i32
    %c0_i32_0 = arith.constant 0 : i32
    %c0_i32_1 = arith.constant 0 : i32
    return %c0_i32, %c0_i32_0 : i32, i32
  }
  func.func @transform_3(%arg0: i32) -> (i32, i32) {
    %c0_i32 = arith.constant 0 : i32
    %c0_i32_0 = arith.constant 0 : i32
    %c0_i32_1 = arith.constant 0 : i32
    return %c0_i32, %c0_i32_0 : i32, i32
  }
  func.func @transform_4(%arg0: i32) -> (i32, i32) {
    %c0_i32 = arith.constant 0 : i32
    %c0_i32_0 = arith.constant 0 : i32
    %c0_i32_1 = arith.constant 0 : i32
    return %c0_i32, %c0_i32_0 : i32, i32
  }
  func.func @transform_5(%arg0: i32) -> (i32, i32) {
    %c0_i32 = arith.constant 0 : i32
    %c0_i32_0 = arith.constant 0 : i32
    return %arg0, %c0_i32 : i32, i32
  }
}

</mosaic_0001>

<bundles_post_ra>
// kernel: dnn_forward.1
= control target key start
LH: loop header
LB: loop body
LE: loop exit
PB: predicated region body
PF: predicated region fallthrough
CT: control target
= control target key end

     0   :  { %10 = vsyncpa [#allocation3], 0  ;;  %s4594_s0 = inlined_call_operand.vmem [shape: bf16[8,384], index: 0, kind: input, shape index: {}]   ;;  %s4595_s1 = inlined_call_operand.hbm [shape: bf16[384,1024], index: 1, kind: input, shape index: {}]   ;;  %s4596_s2 = inlined_call_operand.vmem [shape: f32[1,1024], index: 2, kind: input, shape index: {}]   ;;  %s4597_s3 = inlined_call_operand.hbm [shape: bf16[1024,512], index: 3, kind: input, shape index: {}]   ;;  %s4598_s4 = inlined_call_operand.vmem [shape: f32[1,512], index: 4, kind: input, shape index: {}]   ;;  %s4599_s5 = inlined_call_operand.vmem [shape: f32[8,512], index: 5, kind: output, shape index: {}]  }
   0x1   :  { %11 = vsyncpa [#allocation5], 0  ;;  %s4433_s18 = smov [#allocation2]   ;;  %s4385_s22 = scalar_lea.hbm %s4595_s1, 24576 }
   0x2   :  { %s19_s19 = sshll.u32 %s4433_s18, 4  ;;  %p4386_p0 = scmp.ne.s32.totalorder %s4595_s1, %s4385_s22  ;;  %s20_s19 = int_to_ptr.vmem [resolvable:$true] %s19_s19 }
   0x3   :  { %p4389_p1 = scmp.lt.u32.totalorder %s4385_s22, %s4595_s1 }
   0x5   :  { %p4391_p2 = pnand %p4389_p1, %p4386_p0 }
   0x7   :  { %4394 = shalt.err (!%p4391_p2)
}
   0x8   :  { %s4395_s27 = scalar_lea.vmem %s20_s19, 24576  ;;  %p4400_p4 = scmp.lt.s32.totalorder %s20_s19, %s20_s19 }
   0x9   :  { %p4396_p3 = scmp.ne.s32.totalorder %s20_s19, %s4395_s27  ;;  %p4401_p5 = scmp.lt.s32.totalorder %s4395_s27, %s4395_s27 }
   0xb   :  { %p4402_p6 = por %p4401_p5, %p4400_p4 }
   0xd   :  { %p4403_p7 = pnand %p4402_p6, %p4396_p3 }
   0xf   :  { %4406 = shalt.err (!%p4403_p7)
}
  0x10   :  { %s4434_s28 = smov 512   ;;  %s4435_s29 = smov 32  }
  0x11   :  { %25 = dma.hbm_to_vmem [thread:$0]  %s4595_s1, 24576, %s20_s19, [#allocation3], %s4434_s28, %s4434_s28, %s4435_s29  }
  0x12   :  { %s4436_s7 = smov [#allocation4]   ;;  %s4407_s11 = scalar_lea.hbm %s4597_s3, 32768 }
  0x13   :  { %s33_s8 = sshll.u32 %s4436_s7, 4  ;;  %p4408_p8 = scmp.ne.s32.totalorder %s4597_s3, %s4407_s11  ;;  %s34_s8 = int_to_ptr.vmem [resolvable:$true] %s33_s8 }
  0x14   :  { %p4411_p9 = scmp.lt.u32.totalorder %s4407_s11, %s4597_s3 }
  0x16   :  { %p4413_p10 = pnand %p4411_p9, %p4408_p8 }
  0x18   :  { %4416 = shalt.err (!%p4413_p10)
}
  0x19   :  { %s4417_s16 = scalar_lea.vmem %s34_s8, 32768  ;;  %p4422_p12 = scmp.lt.s32.totalorder %s34_s8, %s34_s8 }
  0x1a   :  { %p4418_p11 = scmp.ne.s32.totalorder %s34_s8, %s4417_s16  ;;  %p4423_p13 = scmp.lt.s32.totalorder %s4417_s16, %s4417_s16 }
  0x1c   :  { %p4424_p0 = por %p4423_p13, %p4422_p12 }
  0x1e   :  { %p4425_p1 = pnand %p4424_p0, %p4418_p11 }
  0x20   :  { %4428 = shalt.err (!%p4425_p1)
}
  0x21   :  { %s4437_s1 = smov 256   ;;  %s4438_s17 = smov 16  }
  0x22   :  { %39 = dma.hbm_to_vmem [thread:$0]  %s4597_s3, 32768, %s34_s8, [#allocation5], %s4437_s1, %s4437_s1, %s4438_s17  }
  0x23   :  { %4429 = dma.done.wait [#allocation3], 24576  }
  0x24   :  { %4430 = vsyncadd [#allocation3], 4294942720 }
  0x25   :  { %4431 = dma.done.wait [#allocation5], 32768  }
  0x26   :  { %4432 = vsyncadd [#allocation5], 4294934528  ;;  %v51_v0 = vld [vmem:[#allocation2] sm:$0xff]  ;;  %v52_v10 = vld [vmem:[#allocation2 + $0x8] sm:$0xff] }
  0x27   :  { %v55_v1 = vld [vmem:[#allocation2 + $0x20] sm:$0xff]  ;;  %v56_v11 = vld [vmem:[#allocation2 + $0x28] sm:$0xff] }
  0x28   :  { %v59_v2 = vld [vmem:[#allocation2 + $0x40] sm:$0xff]  ;;  %v3492_v3 = vcombine.high %v51_v0, %v55_v1  ;;  %v3491_v4 = vcombine.low %v51_v0, %v55_v1  ;;  %v3494_v13 = vcombine.high %v52_v10, %v56_v11  ;;  %v3493_v14 = vcombine.low %v52_v10, %v56_v11  ;;  %v60_v15 = vld [vmem:[#allocation2 + $0x48] sm:$0xff] }
  0x29   :  { %v63_v5 = vld [vmem:[#allocation2 + $0x60] sm:$0xff]  ;;  %v64_v16 = vld [vmem:[#allocation2 + $0x68] sm:$0xff] }
  0x2a   :  { %v3500_v6 = vcombine.high %v59_v2, %v63_v5  ;;  %v67_v7 = vld [vmem:[#allocation2 + $0x80] sm:$0xff]  ;;  %1256 = vmatprep.subr.bf16.mxu0 %v3492_v3  ;;  %v3499_v9 = vcombine.low %v59_v2, %v63_v5  ;;  %v3502_v19 = vcombine.high %v60_v15, %v64_v16  ;;  %v68_v20 = vld [vmem:[#allocation2 + $0x88] sm:$0xff]  ;;  %1338 = vmatprep.subr.bf16.mxu1 %v3494_v13 }
  0x2b   :  { %v71_v8 = vld [vmem:[#allocation2 + $0xa0] sm:$0xff]  ;;  %1257 = vmatpush1.bf16.msra.mxu0 %v3491_v4  ;;  %v72_v21 = vld [vmem:[#allocation2 + $0xa8] sm:$0xff]  ;;  %1339 = vmatpush1.bf16.msra.mxu1 %v3493_v14  ;;  %v3501_v23 = vcombine.low %v60_v15, %v64_v16 }
  0x2c   :  { %1258 = vmatprep.subr.bf16.mxu0 %v3500_v6  ;;  %v3508_v12 = vcombine.high %v67_v7, %v71_v8  ;;  %v75_v17 = vld [vmem:[#allocation2 + $0xc0] sm:$0xff]  ;;  %v3507_v22 = vcombine.low %v67_v7, %v71_v8  ;;  %1340 = vmatprep.subr.bf16.mxu1 %v3502_v19  ;;  %v3510_v26 = vcombine.high %v68_v20, %v72_v21  ;;  %v76_v28 = vld [vmem:[#allocation2 + $0xc8] sm:$0xff] }
  0x2d   :  { %v79_v18 = vld [vmem:[#allocation2 + $0xe0] sm:$0xff]  ;;  %v80_v29 = vld [vmem:[#allocation2 + $0xe8] sm:$0xff]  ;;  %v3509_v31 = vcombine.low %v68_v20, %v72_v21 }
  0x2e   :  { %v3516_v24 = vcombine.high %v75_v17, %v79_v18  ;;  %v83_v25 = vld [vmem:[#allocation2 + $0x100] sm:$0xff]  ;;  %v3515_v30 = vcombine.low %v75_v17, %v79_v18  ;;  %v3518_v34 = vcombine.high %v76_v28, %v80_v29  ;;  %v84_v36 = vld [vmem:[#allocation2 + $0x108] sm:$0xff]  ;;  %v3517_v39 = vcombine.low %v76_v28, %v80_v29 }
  0x2f   :  { %1259 = vmatpush1.bf16.msra.mxu0 %v3499_v9  ;;  %v87_v27 = vld [vmem:[#allocation2 + $0x120] sm:$0xff]  ;;  %1341 = vmatpush1.bf16.msra.mxu1 %v3501_v23  ;;  %v88_v37 = vld [vmem:[#allocation2 + $0x128] sm:$0xff] }
  0x30   :  { %1260 = vmatprep.subr.bf16.mxu0 %v3508_v12  ;;  %v3524_v32 = vcombine.high %v83_v25, %v87_v27  ;;  %v91_v33 = vld [vmem:[#allocation2 + $0x140] sm:$0xff]  ;;  %1342 = vmatprep.subr.bf16.mxu1 %v3510_v26  ;;  %v3523_v38 = vcombine.low %v83_v25, %v87_v27  ;;  %v3526_v43 = vcombine.high %v84_v36, %v88_v37  ;;  %v92_v44 = vld [vmem:[#allocation2 + $0x148] sm:$0xff] }
  0x31   :  { %v95_v35 = vld [vmem:[#allocation2 + $0x160] sm:$0xff]  ;;  %v96_v45 = vld [vmem:[#allocation2 + $0x168] sm:$0xff]  ;;  %v3525_v49 = vcombine.low %v84_v36, %v88_v37 }
  0x32   :  { %v3532_v40 = vcombine.high %v91_v33, %v95_v35  ;;  %v99_v41 = vld [vmem:[#allocation2 + $0x180] sm:$0xff]  ;;  %v3531_v48 = vcombine.low %v91_v33, %v95_v35  ;;  %v3534_v52 = vcombine.high %v92_v44, %v96_v45  ;;  %v100_v54 = vld [vmem:[#allocation2 + $0x188] sm:$0xff]  ;;  %v3533_v57 = vcombine.low %v92_v44, %v96_v45 }
  0x33   :  { %1261 = vmatpush1.bf16.msra.mxu0 %v3507_v22  ;;  %1343 = vmatpush1.bf16.msra.mxu1 %v3509_v31  ;;  %v103_v42 = vld [vmem:[#allocation2 + $0x1a0] sm:$0xff]  ;;  %v104_v55 = vld [vmem:[#allocation2 + $0x1a8] sm:$0xff] }
  0x34   :  { %1262 = vmatprep.subr.bf16.mxu0 %v3516_v24  ;;  %1344 = vmatprep.subr.bf16.mxu1 %v3518_v34  ;;  %v4497_v46 = vld [vmem:[%s4594_s0] sm:$0xff]  ;;  %v3540_v50 = vcombine.high %v99_v41, %v103_v42  ;;  %v3539_v56 = vcombine.low %v99_v41, %v103_v42  ;;  %v3542_v60 = vcombine.high %v100_v54, %v104_v55  ;;  %v108_v62 = vld [vmem:[#allocation2 + $0x1c8] sm:$0xff] }
  0x35   :  { %v4501_v47 = vcombine.high %v4497_v46, %v4497_v46  ;;  %v107_v51 = vld [vmem:[#allocation2 + $0x1c0] sm:$0xff]  ;;  %v112_v63 = vld [vmem:[#allocation2 + $0x1e8] sm:$0xff]  ;;  %v3541_v1 = vcombine.low %v100_v54, %v104_v55 }
  0x36   :  { %v111_v53 = vld [vmem:[#allocation2 + $0x1e0] sm:$0xff]  ;;  %v3550_v4 = vcombine.high %v108_v62, %v112_v63  ;;  %v116_v6 = vld [vmem:[#allocation2 + $0x208] sm:$0xff]  ;;  %v3549_v9 = vcombine.low %v108_v62, %v112_v63 }
  0x37   :  { %1263 = vmatpush1.bf16.msra.mxu0 %v3515_v30  ;;  %1345 = vmatpush1.bf16.msra.mxu1 %v3517_v39  ;;  %v3548_v58 = vcombine.high %v107_v51, %v111_v53  ;;  %v115_v59 = vld [vmem:[#allocation2 + $0x200] sm:$0xff]  ;;  %v3547_v0 = vcombine.low %v107_v51, %v111_v53  ;;  %v120_v7 = vld [vmem:[#allocation2 + $0x228] sm:$0xff] }
  0x38   :  { %1264 = vmatprep.subr.bf16.mxu0 %v3524_v32  ;;  %1346 = vmatprep.subr.bf16.mxu1 %v3526_v43  ;;  %v119_v61 = vld [vmem:[#allocation2 + $0x220] sm:$0xff]  ;;  %v3558_v12 = vcombine.high %v116_v6, %v120_v7  ;;  %v124_v14 = vld [vmem:[#allocation2 + $0x248] sm:$0xff]  ;;  %v3557_v17 = vcombine.low %v116_v6, %v120_v7 }
  0x39   :  { %1288 = vmatprep.mubr.bf16.mxu0 %v4501_v47  ;;  %1370 = vmatprep.mubr.bf16.mxu1 %v4501_v47  ;;  %v3556_v2 = vcombine.high %v115_v59, %v119_v61  ;;  %v123_v3 = vld [vmem:[#allocation2 + $0x240] sm:$0xff]  ;;  %v3555_v8 = vcombine.low %v115_v59, %v119_v61  ;;  %v128_v15 = vld [vmem:[#allocation2 + $0x268] sm:$0xff] }
  0x3a   :  { %v127_v5 = vld [vmem:[#allocation2 + $0x260] sm:$0xff]  ;;  %v3566_v20 = vcombine.high %v124_v14, %v128_v15  ;;  %v132_v22 = vld [vmem:[#allocation2 + $0x288] sm:$0xff]  ;;  %v3565_v25 = vcombine.low %v124_v14, %v128_v15 }
  0x3b   :  { %1265 = vmatpush1.bf16.msra.mxu0 %v3523_v38  ;;  %1347 = vmatpush1.bf16.msra.mxu1 %v3525_v49  ;;  %v3564_v10 = vcombine.high %v123_v3, %v127_v5  ;;  %v131_v11 = vld [vmem:[#allocation2 + $0x280] sm:$0xff]  ;;  %v3563_v16 = vcombine.low %v123_v3, %v127_v5  ;;  %v136_v23 = vld [vmem:[#allocation2 + $0x2a8] sm:$0xff] }
  0x3c   :  { %1266 = vmatprep.subr.bf16.mxu0 %v3532_v40  ;;  %1348 = vmatprep.subr.bf16.mxu1 %v3534_v52  ;;  %v135_v13 = vld [vmem:[#allocation2 + $0x2a0] sm:$0xff]  ;;  %v3574_v28 = vcombine.high %v132_v22, %v136_v23  ;;  %v140_v30 = vld [vmem:[#allocation2 + $0x2c8] sm:$0xff]  ;;  %v3573_v33 = vcombine.low %v132_v22, %v136_v23 }
  0x3d   :  { %v3572_v18 = vcombine.high %v131_v11, %v135_v13  ;;  %v139_v19 = vld [vmem:[#allocation2 + $0x2c0] sm:$0xff]  ;;  %v3571_v24 = vcombine.low %v131_v11, %v135_v13  ;;  %v144_v31 = vld [vmem:[#allocation2 + $0x2e8] sm:$0xff] }
  0x3e   :  { %v143_v21 = vld [vmem:[#allocation2 + $0x2e0] sm:$0xff]  ;;  %v3582_v36 = vcombine.high %v140_v30, %v144_v31  ;;  %v148_v38 = vld [vmem:[#allocation2 + $0x308] sm:$0xff]  ;;  %v3581_v41 = vcombine.low %v140_v30, %v144_v31 }
  0x3f   :  { %1267 = vmatpush1.bf16.msra.mxu0 %v3531_v48  ;;  %1349 = vmatpush1.bf16.msra.mxu1 %v3533_v57  ;;  %v3580_v26 = vcombine.high %v139_v19, %v143_v21  ;;  %v147_v27 = vld [vmem:[#allocation2 + $0x300] sm:$0xff]  ;;  %v3579_v32 = vcombine.low %v139_v19, %v143_v21  ;;  %v152_v39 = vld [vmem:[#allocation2 + $0x328] sm:$0xff] }
  0x40   :  { %1268 = vmatprep.subr.bf16.mxu0 %v3540_v50  ;;  %1350 = vmatprep.subr.bf16.mxu1 %v3542_v60  ;;  %v151_v29 = vld [vmem:[#allocation2 + $0x320] sm:$0xff]  ;;  %v3590_v44 = vcombine.high %v148_v38, %v152_v39  ;;  %v156_v48 = vld [vmem:[#allocation2 + $0x348] sm:$0xff]  ;;  %v3589_v51 = vcombine.low %v148_v38, %v152_v39 }
  0x41   :  { %v3588_v34 = vcombine.high %v147_v27, %v151_v29  ;;  %v155_v35 = vld [vmem:[#allocation2 + $0x340] sm:$0xff]  ;;  %v3587_v40 = vcombine.low %v147_v27, %v151_v29  ;;  %v160_v49 = vld [vmem:[#allocation2 + $0x368] sm:$0xff] }
  0x42   :  { %v159_v37 = vld [vmem:[#allocation2 + $0x360] sm:$0xff]  ;;  %v3598_v54 = vcombine.high %v156_v48, %v160_v49  ;;  %v168_v57 = vld [vmem:[#allocation2 + $0x3a8] sm:$0xff]  ;;  %v3597_v59 = vcombine.low %v156_v48, %v160_v49 }
  0x43   :  { %1269 = vmatpush1.bf16.msra.mxu0 %v3539_v56  ;;  %1351 = vmatpush1.bf16.msra.mxu1 %v3541_v1  ;;  %v3596_v42 = vcombine.high %v155_v35, %v159_v37  ;;  %v163_v43 = vld [vmem:[#allocation2 + $0x380] sm:$0xff]  ;;  %v3595_v50 = vcombine.low %v155_v35, %v159_v37  ;;  %v164_v56 = vld [vmem:[#allocation2 + $0x388] sm:$0xff] }
  0x44   :  { %1270 = vmatprep.subr.bf16.mxu0 %v3548_v58  ;;  %1352 = vmatprep.subr.bf16.mxu1 %v3550_v4  ;;  %v167_v45 = vld [vmem:[#allocation2 + $0x3a0] sm:$0xff]  ;;  %v3606_v62 = vcombine.high %v164_v56, %v168_v57  ;;  %v176_v1 = vld [vmem:[#allocation2 + $0x3e8] sm:$0xff]  ;;  %v3605_v5 = vcombine.low %v164_v56, %v168_v57 }
  0x45   :  { %v3604_v52 = vcombine.high %v163_v43, %v167_v45  ;;  %v171_v53 = vld [vmem:[#allocation2 + $0x3c0] sm:$0xff]  ;;  %v3603_v58 = vcombine.low %v163_v43, %v167_v45  ;;  %v180_v6 = vld [vmem:[#allocation2 + $0x408] sm:$0xff] }
  0x46   :  { %v175_v55 = vld [vmem:[#allocation2 + $0x3e0] sm:$0xff]  ;;  %v184_v7 = vld [vmem:[#allocation2 + $0x428] sm:$0xff] }
  0x47   :  { %1271 = vmatpush1.bf16.msra.mxu0 %v3547_v0  ;;  %1353 = vmatpush1.bf16.msra.mxu1 %v3549_v9  ;;  %v3612_v60 = vcombine.high %v171_v53, %v175_v55  ;;  %v179_v61 = vld [vmem:[#allocation2 + $0x400] sm:$0xff]  ;;  %v172_v0 = vld [vmem:[#allocation2 + $0x3c8] sm:$0xff] }
  0x48   :  { %1272 = vmatprep.subr.bf16.mxu0 %v3556_v2  ;;  %1354 = vmatprep.subr.bf16.mxu1 %v3558_v12  ;;  %v183_v63 = vld [vmem:[#allocation2 + $0x420] sm:$0xff]  ;;  %v3611_v2 = vcombine.low %v171_v53, %v175_v55  ;;  %v3614_v9 = vcombine.high %v172_v0, %v176_v1  ;;  %v3613_v14 = vcombine.low %v172_v0, %v176_v1  ;;  %v188_v15 = vld [vmem:[#allocation2 + $0x448] sm:$0xff] }
  0x49   :  { %v187_v3 = vld [vmem:[#allocation2 + $0x440] sm:$0xff]  ;;  %v3619_v11 = vcombine.low %v179_v61, %v183_v63  ;;  %v212_v39 = vld [vmem:[#allocation2 + $0x508] sm:$0xff] }
  0x4a   :  { %v191_v4 = vld [vmem:[#allocation2 + $0x460] sm:$0xff]  ;;  %v220_v49 = vld [vmem:[#allocation2 + $0x548] sm:$0xff] }
  0x4b   :  { %1273 = vmatpush1.bf16.msra.mxu0 %v3555_v8  ;;  %1355 = vmatpush1.bf16.msra.mxu1 %v3557_v17  ;;  %v3620_v8 = vcombine.high %v179_v61, %v183_v63  ;;  %v195_v12 = vld [vmem:[#allocation2 + $0x480] sm:$0xff]  ;;  %v3628_v17 = vcombine.high %v187_v3, %v191_v4  ;;  %v3627_v19 = vcombine.low %v187_v3, %v191_v4  ;;  %v228_v57 = vld [vmem:[#allocation2 + $0x588] sm:$0xff]  ;;  %v57_v63 = vld [vmem:[#allocation2 + $0x30] sm:$0xff] }
  0x4c   :  { %1274 = vmatprep.subr.bf16.mxu0 %v3564_v10  ;;  %1356 = vmatprep.subr.bf16.mxu1 %v3566_v20  ;;  %v4507_v10 = vcombine.low %v4497_v46, %v4497_v46  ;;  %v199_v13 = vld [vmem:[#allocation2 + $0x4a0] sm:$0xff]  ;;  %v3621_v20 = vcombine.low %v180_v6, %v184_v7  ;;  %v236_v1 = vld [vmem:[#allocation2 + $0x5c8] sm:$0xff] }
  0x4d   :  { %v3636_v46 = vcombine.high %v195_v12, %v199_v13  ;;  %v203_v21 = vld [vmem:[#allocation2 + $0x4c0] sm:$0xff]  ;;  %v3635_v27 = vcombine.low %v195_v12, %v199_v13  ;;  %v240_v4 = vld [vmem:[#allocation2 + $0x5e8] sm:$0xff] }
  0x4e   :  { %v207_v22 = vld [vmem:[#allocation2 + $0x4e0] sm:$0xff]  ;;  %v3678_v13 = vcombine.high %v236_v1, %v240_v4 }
  0x4f   :  { %1275 = vmatpush1.bf16.msra.mxu0 %v3563_v16  ;;  %1357 = vmatpush1.bf16.msra.mxu1 %v3565_v25  ;;  %v192_v16 = vld [vmem:[#allocation2 + $0x468] sm:$0xff]  ;;  %v4439_v25 = vmov 0   ;;  %v215_v29 = vld [vmem:[#allocation2 + $0x520] sm:$0xff]  ;;  %v3644_v31 = vcombine.high %v203_v21, %v207_v22  ;;  %v3643_v35 = vcombine.low %v203_v21, %v207_v22  ;;  %v66_v21 = vld [vmem:[#allocation2 + $0x78] sm:$0xff] }
  0x50   :  { %1276 = vmatprep.subr.bf16.mxu0 %v3572_v18  ;;  %1358 = vmatprep.subr.bf16.mxu1 %v3574_v28  ;;  %v3622_v18 = vcombine.high %v180_v6, %v184_v7  ;;  %v3630_v23 = vcombine.high %v188_v15, %v192_v16  ;;  %v211_v28 = vld [vmem:[#allocation2 + $0x500] sm:$0xff]  ;;  %v3629_v30 = vcombine.low %v188_v15, %v192_v16  ;;  %v61_v6 = vld [vmem:[#allocation2 + $0x50] sm:$0xff] }
  0x51   :  { %v223_v37 = vld [vmem:[#allocation2 + $0x560] sm:$0xff]  ;;  %v3651_v43 = vcombine.low %v211_v28, %v215_v29  ;;  %v65_v7 = vld [vmem:[#allocation2 + $0x70] sm:$0xff] }
  0x52   :  { %v231_v45 = vld [vmem:[#allocation2 + $0x5a0] sm:$0xff]  ;;  %v69_v16 = vld [vmem:[#allocation2 + $0x90] sm:$0xff]  ;;  %v3503_v22 = vcombine.low %v61_v6, %v65_v7 }
  0x53   :  { %1277 = vmatpush1.bf16.msra.mxu0 %v3571_v24  ;;  %1359 = vmatpush1.bf16.msra.mxu1 %v3573_v33  ;;  %v196_v24 = vld [vmem:[#allocation2 + $0x488] sm:$0xff]  ;;  %v239_v55 = vld [vmem:[#allocation2 + $0x5e0] sm:$0xff] }
  0x54   :  { %1278 = vmatprep.subr.bf16.mxu0 %v3580_v26  ;;  %1360 = vmatprep.subr.bf16.mxu1 %v3582_v36  ;;  %v200_v26 = vld [vmem:[#allocation2 + $0x4a8] sm:$0xff]  ;;  %v219_v36 = vld [vmem:[#allocation2 + $0x540] sm:$0xff] }
  0x55   :  { %v204_v33 = vld [vmem:[#allocation2 + $0x4c8] sm:$0xff]  ;;  %v3637_v38 = vcombine.low %v196_v24, %v200_v26  ;;  %v3659_v53 = vcombine.low %v219_v36, %v223_v37 }
  0x57   :  { %1279 = vmatpush1.bf16.msra.mxu0 %v3579_v32  ;;  %1361 = vmatpush1.bf16.msra.mxu1 %v3581_v41  ;;  %v3638_v32 = vcombine.high %v196_v24, %v200_v26  ;;  %v81_v24 = vld [vmem:[#allocation2 + $0xf0] sm:$0xff] }
  0x58   :  { %1280 = vmatprep.subr.bf16.mxu0 %v3588_v34  ;;  %1362 = vmatprep.subr.bf16.mxu1 %v3590_v44  ;;  %v208_v34 = vld [vmem:[#allocation2 + $0x4e8] sm:$0xff]  ;;  %v227_v44 = vld [vmem:[#allocation2 + $0x580] sm:$0xff] }
  0x59   :  { %v3646_v41 = vcombine.high %v204_v33, %v208_v34  ;;  %v3645_v48 = vcombine.low %v204_v33, %v208_v34  ;;  %v3667_v61 = vcombine.low %v227_v44, %v231_v45  ;;  %v89_v33 = vld [vmem:[#allocation2 + $0x130] sm:$0xff] }
  0x5b   :  { %1281 = vmatpush1.bf16.msra.mxu0 %v3587_v40  ;;  %1363 = vmatpush1.bf16.msra.mxu1 %v3589_v51  ;;  %v3652_v40 = vcombine.high %v211_v28, %v215_v29 }
  0x5c   :  { %1282 = vmatprep.subr.bf16.mxu0 %v3596_v42  ;;  %1364 = vmatprep.subr.bf16.mxu1 %v3598_v54  ;;  %v216_v42 = vld [vmem:[#allocation2 + $0x528] sm:$0xff]  ;;  %v235_v54 = vld [vmem:[#allocation2 + $0x5c0] sm:$0xff] }
  0x5d   :  { %v3654_v51 = vcombine.high %v212_v39, %v216_v42  ;;  %v3653_v56 = vcombine.low %v212_v39, %v216_v42 }
  0x5f   :  { %1283 = vmatpush1.bf16.msra.mxu0 %v3595_v50  ;;  %1365 = vmatpush1.bf16.msra.mxu1 %v3597_v59  ;;  %v3660_v50 = vcombine.high %v219_v36, %v223_v37 }
  0x60   :  { %1284 = vmatprep.subr.bf16.mxu0 %v3604_v52  ;;  %1366 = vmatprep.subr.bf16.mxu1 %v3606_v62  ;;  %v224_v52 = vld [vmem:[#allocation2 + $0x568] sm:$0xff]  ;;  %v53_v62 = vld [vmem:[#allocation2 + $0x10] sm:$0xff] }
  0x61   :  { %v3662_v59 = vcombine.high %v220_v49, %v224_v52  ;;  %v3661_v0 = vcombine.low %v220_v49, %v224_v52  ;;  %v3496_v12 = vcombine.high %v53_v62, %v57_v63  ;;  %v3495_v15 = vcombine.low %v53_v62, %v57_v63  ;;  %v106_v63 = vld [vmem:[#allocation2 + $0x1b8] sm:$0xff] }
  0x63   :  { %1285 = vmatpush1.bf16.msra.mxu0 %v3603_v58  ;;  %1367 = vmatpush1.bf16.msra.mxu1 %v3605_v5  ;;  %v3668_v58 = vcombine.high %v227_v44, %v231_v45  ;;  %v3675_v5 = vcombine.low %v235_v54, %v239_v55 }
  0x64   :  { %1286 = vmatprep.subr.bf16.mxu0 %v3612_v60  ;;  %1368 = vmatprep.subr.bf16.mxu1 %v3614_v9  ;;  %v232_v60 = vld [vmem:[#allocation2 + $0x5a8] sm:$0xff]  ;;  %v54_v9 = vld [vmem:[#allocation2 + $0x18] sm:$0xff] }
  0x65   :  { %v3670_v3 = vcombine.high %v228_v57, %v232_v60 }
  0x67   :  { %1287 = vmatpush1.bf16.msra.mxu0 %v3611_v2  ;;  %1369 = vmatpush1.bf16.msra.mxu1 %v3613_v14  ;;  %v3676_v2 = vcombine.high %v235_v54, %v239_v55  ;;  %v58_v14 = vld [vmem:[#allocation2 + $0x38] sm:$0xff] }
  0x68   :  { %1297 = vmatprep.subr.bf16.mxu0 %v3620_v8  ;;  %1379 = vmatprep.subr.bf16.mxu1 %v3622_v18  ;;  %v3669_v8 = vcombine.low %v228_v57, %v232_v60  ;;  %v3677_v18 = vcombine.low %v236_v1, %v240_v4  ;;  %v3497_v26 = vcombine.low %v54_v9, %v58_v14  ;;  %v98_v55 = vld [vmem:[#allocation2 + $0x178] sm:$0xff]  ;;  %v109_v57 = vld [vmem:[#allocation2 + $0x1d0] sm:$0xff] }
  0x69   :  { %v102_v60 = vld [vmem:[#allocation2 + $0x198] sm:$0xff]  ;;  %v117_v1 = vld [vmem:[#allocation2 + $0x210] sm:$0xff] }
  0x6a   :  { %1289 = vmatmul.mubr.bf16.vlgmr.msra.gmra.mrb[0].mxu0 %v4507_v10  ;;  %1371 = vmatmul.mubr.bf16.vlgmr.msra.gmra.mrb[0].mxu1 %v4507_v10  ;;  %v110_v4 = vld [vmem:[#allocation2 + $0x1d8] sm:$0xff] }
  0x6b   :  { %1298 = vmatpush1.bf16.msra.mxu0 %v3619_v11  ;;  %1329 = vmatprep.mubr.bf16.mxu0 %v4439_v25  ;;  %v4516_v11 = vld [vmem:[%s4594_s0 + $0x8] ss:$0 sps:$4 sm:$0xff]  }
  0x6c   :  { %1299 = vmatprep.subr.bf16.mxu0 %v3628_v17  ;;  %1380 = vmatpush1.bf16.msra.mxu1 %v3621_v20  ;;  %v73_v17 = vld [vmem:[#allocation2 + $0xb0] sm:$0xff]  ;;  %v3504_v20 = vcombine.high %v61_v6, %v65_v7  ;;  %v3546_v6 = vcombine.high %v102_v60, %v106_v63  ;;  %v114_v7 = vld [vmem:[#allocation2 + $0x1f8] sm:$0xff] }
  0x6d   :  { %1381 = vmatprep.subr.bf16.mxu1 %v3630_v23  ;;  %1411 = vmatprep.mubr.bf16.mxu1 %v4439_v25  ;;  %v77_v23 = vld [vmem:[#allocation2 + $0xd0] sm:$0xff]  ;;  %v3512_v28 = vcombine.high %v69_v16, %v73_v17 }
  0x6e   :  { %v3520_v36 = vcombine.high %v77_v23, %v81_v24  ;;  %v3519_v39 = vcombine.low %v77_v23, %v81_v24 }
  0x6f   :  { %1300 = vmatpush1.bf16.msra.mxu0 %v3627_v19  ;;  %v62_v19 = vld [vmem:[#allocation2 + $0x58] sm:$0xff] }
  0x70   :  { %1301 = vmatprep.subr.bf16.mxu0 %v3636_v46  ;;  %1382 = vmatpush1.bf16.msra.mxu1 %v3629_v30  ;;  %v3498_v46 = vcombine.high %v54_v9, %v58_v14  ;;  %v3506_v29 = vcombine.high %v62_v19, %v66_v21  ;;  %v74_v30 = vld [vmem:[#allocation2 + $0xb8] sm:$0xff]  ;;  %v3505_v34 = vcombine.low %v62_v19, %v66_v21  ;;  %v125_v9 = vld [vmem:[#allocation2 + $0x250] sm:$0xff] }
  0x71   :  { %1383 = vmatprep.subr.bf16.mxu1 %v3638_v32  ;;  %v85_v32 = vld [vmem:[#allocation2 + $0x110] sm:$0xff]  ;;  %v118_v14 = vld [vmem:[#allocation2 + $0x218] sm:$0xff] }
  0x72   :  { %v3528_v44 = vcombine.high %v85_v32, %v89_v33  ;;  %v3527_v49 = vcombine.low %v85_v32, %v89_v33  ;;  %v133_v19 = vld [vmem:[#allocation2 + $0x290] sm:$0xff]  ;;  %v126_v21 = vld [vmem:[#allocation2 + $0x258] sm:$0xff] }
  0x73   :  { %1302 = vmatpush1.bf16.msra.mxu0 %v3635_v27  ;;  %v70_v27 = vld [vmem:[#allocation2 + $0x98] sm:$0xff] }
  0x74   :  { %1303 = vmatprep.subr.bf16.mxu0 %v3644_v31  ;;  %1384 = vmatpush1.bf16.msra.mxu1 %v3637_v38  ;;  %v3511_v31 = vcombine.low %v69_v16, %v73_v17  ;;  %v3514_v37 = vcombine.high %v70_v27, %v74_v30  ;;  %v82_v38 = vld [vmem:[#allocation2 + $0xf8] sm:$0xff]  ;;  %v3513_v42 = vcombine.low %v70_v27, %v74_v30  ;;  %v141_v27 = vld [vmem:[#allocation2 + $0x2d0] sm:$0xff] }
  0x75   :  { %1385 = vmatprep.subr.bf16.mxu1 %v3646_v41  ;;  %v97_v41 = vld [vmem:[#allocation2 + $0x170] sm:$0xff]  ;;  %v3554_v16 = vcombine.high %v110_v4, %v114_v7  ;;  %v122_v17 = vld [vmem:[#allocation2 + $0x238] sm:$0xff] }
  0x76   :  { %v3562_v24 = vcombine.high %v118_v14, %v122_v17  ;;  %v134_v30 = vld [vmem:[#allocation2 + $0x298] sm:$0xff] }
  0x77   :  { %1304 = vmatpush1.bf16.msra.mxu0 %v3643_v35  ;;  %v78_v35 = vld [vmem:[#allocation2 + $0xd8] sm:$0xff] }
  0x78   :  { %1305 = vmatprep.subr.bf16.mxu0 %v3652_v40  ;;  %1386 = vmatpush1.bf16.msra.mxu1 %v3645_v48  ;;  %v93_v40 = vld [vmem:[#allocation2 + $0x150] sm:$0xff]  ;;  %v3522_v45 = vcombine.high %v78_v35, %v82_v38  ;;  %v90_v48 = vld [vmem:[#allocation2 + $0x138] sm:$0xff]  ;;  %v3521_v52 = vcombine.low %v78_v35, %v82_v38 }
  0x79   :  { %1387 = vmatprep.subr.bf16.mxu1 %v3654_v51  ;;  %v105_v51 = vld [vmem:[#allocation2 + $0x1b0] sm:$0xff]  ;;  %v142_v38 = vld [vmem:[#allocation2 + $0x2d8] sm:$0xff] }
  0x7a   :  { %v149_v35 = vld [vmem:[#allocation2 + $0x310] sm:$0xff] }
  0x7b   :  { %1306 = vmatpush1.bf16.msra.mxu0 %v3651_v43  ;;  %v86_v43 = vld [vmem:[#allocation2 + $0x118] sm:$0xff] }
  0x7c   :  { %1307 = vmatprep.subr.bf16.mxu0 %v3660_v50  ;;  %1388 = vmatpush1.bf16.msra.mxu1 %v3653_v56  ;;  %v101_v50 = vld [vmem:[#allocation2 + $0x190] sm:$0xff]  ;;  %v3530_v54 = vcombine.high %v86_v43, %v90_v48  ;;  %v3535_v56 = vcombine.low %v93_v40, %v97_v41 }
  0x7d   :  { %1389 = vmatprep.subr.bf16.mxu1 %v3662_v59  ;;  %v3529_v59 = vcombine.low %v86_v43, %v90_v48  ;;  %v157_v43 = vld [vmem:[#allocation2 + $0x350] sm:$0xff]  ;;  %v150_v48 = vld [vmem:[#allocation2 + $0x318] sm:$0xff] }
  0x7f   :  { %1308 = vmatpush1.bf16.msra.mxu0 %v3659_v53  ;;  %v94_v53 = vld [vmem:[#allocation2 + $0x158] sm:$0xff] }
  0x80   :  { %1309 = vmatprep.subr.bf16.mxu0 %v3668_v58  ;;  %1390 = vmatpush1.bf16.msra.mxu1 %v3661_v0  ;;  %v113_v58 = vld [vmem:[#allocation2 + $0x1f0] sm:$0xff]  ;;  %v3538_v62 = vcombine.high %v94_v53, %v98_v55  ;;  %v3543_v0 = vcombine.low %v101_v50, %v105_v51 }
  0x81   :  { %1391 = vmatprep.subr.bf16.mxu1 %v3670_v3  ;;  %v3537_v3 = vcombine.low %v94_v53, %v98_v55  ;;  %v165_v53 = vld [vmem:[#allocation2 + $0x390] sm:$0xff]  ;;  %v158_v55 = vld [vmem:[#allocation2 + $0x358] sm:$0xff] }
  0x83   :  { %1310 = vmatpush1.bf16.msra.mxu0 %v3667_v61  ;;  %v3544_v61 = vcombine.high %v101_v50, %v105_v51 }
  0x84   :  { %1311 = vmatprep.subr.bf16.mxu0 %v3676_v2  ;;  %1392 = vmatpush1.bf16.msra.mxu1 %v3669_v8  ;;  %v121_v2 = vld [vmem:[#allocation2 + $0x230] sm:$0xff]  ;;  %v3551_v8 = vcombine.low %v109_v57, %v113_v58 }
  0x85   :  { %1393 = vmatprep.subr.bf16.mxu1 %v3678_v13  ;;  %v3545_v13 = vcombine.low %v102_v60, %v106_v63  ;;  %v173_v60 = vld [vmem:[#allocation2 + $0x3d0] sm:$0xff]  ;;  %v166_v63 = vld [vmem:[#allocation2 + $0x398] sm:$0xff] }
  0x87   :  { %1312 = vmatpush1.bf16.msra.mxu0 %v3675_v5  ;;  %v3552_v5 = vcombine.high %v109_v57, %v113_v58 }
  0x88   :  { %1420 = vmatprep.subr.bf16.mxu0 %v3496_v12  ;;  %1394 = vmatpush1.bf16.msra.mxu1 %v3677_v18  ;;  %v129_v12 = vld [vmem:[#allocation2 + $0x270] sm:$0xff]  ;;  %v3559_v18 = vcombine.low %v117_v1, %v121_v2 }
  0x89   :  { %1502 = vmatprep.subr.bf16.mxu1 %v3498_v46  ;;  %v3553_v46 = vcombine.low %v110_v4, %v114_v7  ;;  %v3568_v23 = vcombine.high %v125_v9, %v129_v12  ;;  %v181_v4 = vld [vmem:[#allocation2 + $0x410] sm:$0xff]  ;;  %v174_v7 = vld [vmem:[#allocation2 + $0x3d8] sm:$0xff] }
  0x8a   :  { %1330 = vmatmul.mubr.bf16.vlgmr.msra.gmra.mrb[0].mxu0 %v4516_v11 }
  0x8b   :  { %1421 = vmatpush1.bf16.msra.mxu0 %v3495_v15  ;;  %1452 = vmatprep.mubr.bf16.mxu0 %v4501_v47  ;;  %v3560_v15 = vcombine.high %v117_v1, %v121_v2 }
  0x8c   :  { %1422 = vmatprep.subr.bf16.mxu0 %v3504_v20  ;;  %1412 = vmatmul.mubr.bf16.vlgmr.msra.gmra.mrb[0].mxu1 %v4516_v11  ;;  %v137_v20 = vld [vmem:[#allocation2 + $0x2b0] sm:$0xff] }
  0x8d   :  { %1503 = vmatpush1.bf16.msra.mxu1 %v3497_v26  ;;  %1534 = vmatprep.mubr.bf16.mxu1 %v4501_v47  ;;  %v3536_v47 = vcombine.high %v93_v40, %v97_v41  ;;  %v3567_v26 = vcombine.low %v125_v9, %v129_v12  ;;  %v3576_v32 = vcombine.high %v133_v19, %v137_v20 }
  0x8e   :  { %1504 = vmatprep.subr.bf16.mxu1 %v3506_v29  ;;  %v3561_v29 = vcombine.low %v118_v14, %v122_v17  ;;  %v189_v14 = vld [vmem:[#allocation2 + $0x450] sm:$0xff]  ;;  %v182_v17 = vld [vmem:[#allocation2 + $0x418] sm:$0xff] }
  0x8f   :  { %1423 = vmatpush1.bf16.msra.mxu0 %v3503_v22  ;;  %v130_v22 = vld [vmem:[#allocation2 + $0x278] sm:$0xff] }
  0x90   :  { %1424 = vmatprep.subr.bf16.mxu0 %v3512_v28  ;;  %v145_v28 = vld [vmem:[#allocation2 + $0x2f0] sm:$0xff]  ;;  %v3570_v33 = vcombine.high %v126_v21, %v130_v22 }
  0x91   :  { %1505 = vmatpush1.bf16.msra.mxu1 %v3505_v34  ;;  %v3575_v34 = vcombine.low %v133_v19, %v137_v20  ;;  %v3584_v40 = vcombine.high %v141_v27, %v145_v28 }
  0x92   :  { %1506 = vmatprep.subr.bf16.mxu1 %v3514_v37  ;;  %v3569_v37 = vcombine.low %v126_v21, %v130_v22  ;;  %v197_v21 = vld [vmem:[#allocation2 + $0x490] sm:$0xff] }
  0x93   :  { %1425 = vmatpush1.bf16.msra.mxu0 %v3511_v31  ;;  %v138_v31 = vld [vmem:[#allocation2 + $0x2b8] sm:$0xff]  ;;  %v201_v22 = vld [vmem:[#allocation2 + $0x4b0] sm:$0xff] }
  0x94   :  { %1426 = vmatprep.subr.bf16.mxu0 %v3520_v36  ;;  %v153_v36 = vld [vmem:[#allocation2 + $0x330] sm:$0xff]  ;;  %v3578_v41 = vcombine.high %v134_v30, %v138_v31 }
  0x95   :  { %1507 = vmatpush1.bf16.msra.mxu1 %v3513_v42  ;;  %v3583_v42 = vcombine.low %v141_v27, %v145_v28  ;;  %v3592_v50 = vcombine.high %v149_v35, %v153_v36 }
  0x96   :  { %1508 = vmatprep.subr.bf16.mxu1 %v3522_v45  ;;  %v3577_v45 = vcombine.low %v134_v30, %v138_v31  ;;  %v205_v30 = vld [vmem:[#allocation2 + $0x4d0] sm:$0xff] }
  0x97   :  { %1427 = vmatpush1.bf16.msra.mxu0 %v3519_v39  ;;  %v146_v39 = vld [vmem:[#allocation2 + $0x2f8] sm:$0xff]  ;;  %v209_v31 = vld [vmem:[#allocation2 + $0x4f0] sm:$0xff] }
  0x98   :  { %1428 = vmatprep.subr.bf16.mxu0 %v3528_v44  ;;  %v161_v44 = vld [vmem:[#allocation2 + $0x370] sm:$0xff]  ;;  %v3586_v51 = vcombine.high %v142_v38, %v146_v39 }
  0x99   :  { %1509 = vmatpush1.bf16.msra.mxu1 %v3521_v52  ;;  %v3591_v52 = vcombine.low %v149_v35, %v153_v36  ;;  %v3600_v57 = vcombine.high %v157_v43, %v161_v44  ;;  %v3640_v35 = vcombine.high %v197_v21, %v201_v22 }
  0x9a   :  { %1510 = vmatprep.subr.bf16.mxu1 %v3530_v54  ;;  %v3585_v54 = vcombine.low %v142_v38, %v146_v39  ;;  %v213_v38 = vld [vmem:[#allocation2 + $0x510] sm:$0xff] }
  0x9b   :  { %1429 = vmatpush1.bf16.msra.mxu0 %v3527_v49  ;;  %v154_v49 = vld [vmem:[#allocation2 + $0x338] sm:$0xff]  ;;  %v217_v39 = vld [vmem:[#allocation2 + $0x530] sm:$0xff] }
  0x9c   :  { %1430 = vmatprep.subr.bf16.mxu0 %v3536_v47  ;;  %v169_v47 = vld [vmem:[#allocation2 + $0x3b0] sm:$0xff]  ;;  %v3594_v58 = vcombine.high %v150_v48, %v154_v49 }
  0x9d   :  { %1511 = vmatpush1.bf16.msra.mxu1 %v3529_v59  ;;  %v3599_v59 = vcombine.low %v157_v43, %v161_v44  ;;  %v3608_v1 = vcombine.high %v165_v53, %v169_v47  ;;  %v210_v44 = vld [vmem:[#allocation2 + $0x4f8] sm:$0xff] }
  0x9e   :  { %1512 = vmatprep.subr.bf16.mxu1 %v3538_v62  ;;  %v3593_v62 = vcombine.low %v150_v48, %v154_v49  ;;  %v221_v49 = vld [vmem:[#allocation2 + $0x550] sm:$0xff] }
  0x9f   :  { %1431 = vmatpush1.bf16.msra.mxu0 %v3535_v56  ;;  %v162_v56 = vld [vmem:[#allocation2 + $0x378] sm:$0xff] }
  0xa0   :  { %1432 = vmatprep.subr.bf16.mxu0 %v3544_v61  ;;  %v177_v61 = vld [vmem:[#allocation2 + $0x3f0] sm:$0xff]  ;;  %v3602_v2 = vcombine.high %v158_v55, %v162_v56 }
  0xa1   :  { %1513 = vmatpush1.bf16.msra.mxu1 %v3537_v3  ;;  %v3607_v3 = vcombine.low %v165_v53, %v169_v47  ;;  %v3616_v9 = vcombine.high %v173_v60, %v177_v61  ;;  %v218_v53 = vld [vmem:[#allocation2 + $0x538] sm:$0xff]  ;;  %v3655_v47 = vcombine.low %v213_v38, %v217_v39 }
  0xa2   :  { %1514 = vmatprep.subr.bf16.mxu1 %v3546_v6  ;;  %v3601_v6 = vcombine.low %v158_v55, %v162_v56  ;;  %v229_v56 = vld [vmem:[#allocation2 + $0x590] sm:$0xff] }
  0xa3   :  { %1433 = vmatpush1.bf16.msra.mxu0 %v3543_v0  ;;  %v170_v0 = vld [vmem:[#allocation2 + $0x3b8] sm:$0xff] }
  0xa4   :  { %1434 = vmatprep.subr.bf16.mxu0 %v3552_v5  ;;  %v185_v5 = vld [vmem:[#allocation2 + $0x430] sm:$0xff]  ;;  %v3610_v12 = vcombine.high %v166_v63, %v170_v0 }
  0xa5   :  { %1515 = vmatpush1.bf16.msra.mxu1 %v3545_v13  ;;  %v3615_v13 = vcombine.low %v173_v60, %v177_v61  ;;  %v3624_v19 = vcombine.high %v181_v4, %v185_v5 }
  0xa6   :  { %1516 = vmatprep.subr.bf16.mxu1 %v3554_v16  ;;  %v3609_v16 = vcombine.low %v166_v63, %v170_v0  ;;  %v237_v63 = vld [vmem:[#allocation2 + $0x5d0] sm:$0xff] }
  0xa7   :  { %1435 = vmatpush1.bf16.msra.mxu0 %v3551_v8  ;;  %v178_v8 = vld [vmem:[#allocation2 + $0x3f8] sm:$0xff] }
  0xa8   :  { %1436 = vmatprep.subr.bf16.mxu0 %v3560_v15  ;;  %v193_v15 = vld [vmem:[#allocation2 + $0x470] sm:$0xff]  ;;  %v3618_v20 = vcombine.high %v174_v7, %v178_v8 }
  0xa9   :  { %1517 = vmatpush1.bf16.msra.mxu1 %v3553_v46  ;;  %v3623_v46 = vcombine.low %v181_v4, %v185_v5  ;;  %v3632_v27 = vcombine.high %v189_v14, %v193_v15 }
  0xaa   :  { %1518 = vmatprep.subr.bf16.mxu1 %v3562_v24  ;;  %v190_v24 = vld [vmem:[#allocation2 + $0x458] sm:$0xff] }
  0xab   :  { %1437 = vmatpush1.bf16.msra.mxu0 %v3559_v18  ;;  %v186_v18 = vld [vmem:[#allocation2 + $0x438] sm:$0xff] }
  0xac   :  { %1438 = vmatprep.subr.bf16.mxu0 %v3568_v23  ;;  %v3617_v23 = vcombine.low %v174_v7, %v178_v8  ;;  %v3626_v28 = vcombine.high %v182_v17, %v186_v18  ;;  %v238_v8 = vld [vmem:[#allocation2 + $0x5d8] sm:$0xff] }
  0xad   :  { %1519 = vmatpush1.bf16.msra.mxu1 %v3561_v29  ;;  %v3631_v29 = vcombine.low %v189_v14, %v193_v15  ;;  %v4003_v15 = vld [vmem:[#allocation4 + $0x4] ss:$16 sps:$4 sm:$0xff]  }
  0xae   :  { %1520 = vmatprep.subr.bf16.mxu1 %v3570_v33  ;;  %v198_v33 = vld [vmem:[#allocation2 + $0x498] sm:$0xff] }
  0xaf   :  { %1439 = vmatpush1.bf16.msra.mxu0 %v3567_v26  ;;  %v194_v26 = vld [vmem:[#allocation2 + $0x478] sm:$0xff] }
  0xb0   :  { %1440 = vmatprep.subr.bf16.mxu0 %v3576_v32  ;;  %v3625_v32 = vcombine.low %v182_v17, %v186_v18  ;;  %v3634_v36 = vcombine.high %v190_v24, %v194_v26  ;;  %v4001_v17 = vld [vmem:[#allocation4] ss:$16 sps:$4 sm:$0xff]   ;;  %v4006_v18 = vld [vmem:[#allocation4 + $0xc] ss:$16 sps:$4 sm:$0xff]  }
  0xb1   :  { %1521 = vmatpush1.bf16.msra.mxu1 %v3569_v37  ;;  %v3639_v37 = vcombine.low %v197_v21, %v201_v22  ;;  %v4012_v21 = vld [vmem:[#allocation4 + $0x2c] ss:$16 sps:$4 sm:$0xff]   ;;  %v4015_v22 = vld [vmem:[#allocation4 + $0x44] ss:$16 sps:$4 sm:$0xff]  }
  0xb2   :  { %1522 = vmatprep.subr.bf16.mxu1 %v3578_v41  ;;  %v206_v41 = vld [vmem:[#allocation2 + $0x4d8] sm:$0xff] }
  0xb3   :  { %1441 = vmatpush1.bf16.msra.mxu0 %v3575_v34  ;;  %v202_v34 = vld [vmem:[#allocation2 + $0x4b8] sm:$0xff] }
  0xb4   :  { %1442 = vmatprep.subr.bf16.mxu0 %v3584_v40  ;;  %v3633_v40 = vcombine.low %v190_v24, %v194_v26  ;;  %v3642_v43 = vcombine.high %v198_v33, %v202_v34  ;;  %v3641_v48 = vcombine.low %v198_v33, %v202_v34  ;;  %v4013_v24 = vld [vmem:[#allocation4 + $0x40] ss:$16 sps:$4 sm:$0xff]   ;;  %v4018_v26 = vld [vmem:[#allocation4 + $0x4c] ss:$16 sps:$4 sm:$0xff]   ;;  %v4033_v34 = vld [vmem:[#allocation4 + $0xa4] ss:$16 sps:$4 sm:$0xff]  }
  0xb5   :  { %1523 = vmatpush1.bf16.msra.mxu1 %v3577_v45  ;;  %v3647_v45 = vcombine.low %v205_v30, %v209_v31  ;;  %v4030_v33 = vld [vmem:[#allocation4 + $0x8c] ss:$16 sps:$4 sm:$0xff]  }
  0xb6   :  { %1524 = vmatprep.subr.bf16.mxu1 %v3586_v51  ;;  %v225_v51 = vld [vmem:[#allocation2 + $0x570] sm:$0xff] }
  0xb7   :  { %1443 = vmatpush1.bf16.msra.mxu0 %v3583_v42  ;;  %v3648_v42 = vcombine.high %v205_v30, %v209_v31  ;;  %v3664_v55 = vcombine.high %v221_v49, %v225_v51  ;;  %v3663_v60 = vcombine.low %v221_v49, %v225_v51  ;;  %v4024_v30 = vld [vmem:[#allocation4 + $0x6c] ss:$16 sps:$4 sm:$0xff]   ;;  %v4027_v31 = vld [vmem:[#allocation4 + $0x84] ss:$16 sps:$4 sm:$0xff]   ;;  %v4049_v49 = vld [vmem:[#allocation4 + $0x100] ss:$16 sps:$4 sm:$0xff]  }
  0xb8   :  { %1444 = vmatprep.subr.bf16.mxu0 %v3592_v50  ;;  %v3650_v50 = vcombine.high %v206_v41, %v210_v44  ;;  %v4057_v51 = vld [vmem:[#allocation4 + $0x124] ss:$16 sps:$4 sm:$0xff]  }
  0xb9   :  { %1525 = vmatpush1.bf16.msra.mxu1 %v3585_v54  ;;  %v3649_v54 = vcombine.low %v206_v41, %v210_v44  ;;  %v4042_v41 = vld [vmem:[#allocation4 + $0xcc] ss:$16 sps:$4 sm:$0xff]   ;;  %v4043_v44 = vld [vmem:[#allocation4 + $0xe0] ss:$16 sps:$4 sm:$0xff]  }
  0xba   :  { %1526 = vmatprep.subr.bf16.mxu1 %v3594_v58  ;;  %v222_v58 = vld [vmem:[#allocation2 + $0x558] sm:$0xff] }
  0xbb   :  { %1445 = vmatpush1.bf16.msra.mxu0 %v3591_v52  ;;  %v214_v52 = vld [vmem:[#allocation2 + $0x518] sm:$0xff] }
  0xbc   :  { %1446 = vmatprep.subr.bf16.mxu0 %v3600_v57  ;;  %v233_v57 = vld [vmem:[#allocation2 + $0x5b0] sm:$0xff]  ;;  %v3657_v61 = vcombine.low %v214_v52, %v218_v53 }
  0xbd   :  { %1527 = vmatpush1.bf16.msra.mxu1 %v3593_v62  ;;  %v3672_v62 = vcombine.high %v229_v56, %v233_v57  ;;  %v3671_v4 = vcombine.low %v229_v56, %v233_v57  ;;  %v4061_v56 = vld [vmem:[#allocation4 + $0x140] ss:$16 sps:$4 sm:$0xff]   ;;  %v4069_v57 = vld [vmem:[#allocation4 + $0x164] ss:$16 sps:$4 sm:$0xff]  }
  0xbe   :  { %1528 = vmatprep.subr.bf16.mxu1 %v3602_v2  ;;  %v230_v2 = vld [vmem:[#allocation2 + $0x598] sm:$0xff] }
  0xbf   :  { %1447 = vmatpush1.bf16.msra.mxu0 %v3599_v59  ;;  %v226_v59 = vld [vmem:[#allocation2 + $0x578] sm:$0xff] }
  0xc0   :  { %1448 = vmatprep.subr.bf16.mxu0 %v3608_v1  ;;  %v3666_v0 = vcombine.high %v222_v58, %v226_v59  ;;  %v241_v1 = vld [vmem:[#allocation2 + $0x5f0] sm:$0xff]  ;;  %v3665_v5 = vcombine.low %v222_v58, %v226_v59  ;;  %v4064_v58 = vld [vmem:[#allocation4 + $0x148] ss:$16 sps:$4 sm:$0xff]  }
  0xc1   :  { %1529 = vmatpush1.bf16.msra.mxu1 %v3601_v6  ;;  %v3680_v6 = vcombine.high %v237_v63, %v241_v1  ;;  %v4067_v59 = vld [vmem:[#allocation4 + $0x160] ss:$16 sps:$4 sm:$0xff]  }
  0xc2   :  { %1530 = vmatprep.subr.bf16.mxu1 %v3610_v12  ;;  %v3679_v12 = vcombine.low %v237_v63, %v241_v1  ;;  %v4073_v63 = vld [vmem:[#allocation4 + $0x180] ss:$16 sps:$4 sm:$0xff]   ;;  %v4081_v1 = vld [vmem:[#allocation4 + $0x1a4] ss:$16 sps:$4 sm:$0xff]  }
  0xc3   :  { %1449 = vmatpush1.bf16.msra.mxu0 %v3607_v3  ;;  %v234_v3 = vld [vmem:[#allocation2 + $0x5b8] sm:$0xff] }
  0xc4   :  { %1450 = vmatprep.subr.bf16.mxu0 %v3616_v9  ;;  %v3674_v7 = vcombine.high %v230_v2, %v234_v3  ;;  %v242_v9 = vld [vmem:[#allocation2 + $0x5f8] sm:$0xff] }
  0xc5   :  { %1531 = vmatpush1.bf16.msra.mxu1 %v3609_v16  ;;  %v3682_v14 = vcombine.high %v238_v8, %v242_v9  ;;  %v3681_v16 = vcombine.low %v238_v8, %v242_v9  ;;  %v4090_v8 = vld [vmem:[#allocation4 + $0x1cc] ss:$16 sps:$4 sm:$0xff]   ;;  %v4093_v9 = vld [vmem:[#allocation4 + $0x1e4] ss:$16 sps:$4 sm:$0xff]  }
  0xc6   :  { %1532 = vmatprep.subr.bf16.mxu1 %v3618_v20  ;;  %v4004_v20 = vld [vmem:[#allocation4 + $0x8] ss:$16 sps:$4 sm:$0xff]  }
  0xc7   :  { %1451 = vmatpush1.bf16.msra.mxu0 %v3615_v13  ;;  %v3673_v13 = vcombine.low %v230_v2, %v234_v3  ;;  %v4076_v2 = vld [vmem:[#allocation4 + $0x188] ss:$16 sps:$4 sm:$0xff]   ;;  %v4079_v3 = vld [vmem:[#allocation4 + $0x1a0] ss:$16 sps:$4 sm:$0xff]  }
  0xc8   :  { %1461 = vmatprep.subr.bf16.mxu0 %v3624_v19  ;;  %v4009_v19 = vld [vmem:[#allocation4 + $0x24] ss:$16 sps:$4 sm:$0xff]  }
  0xc9   :  { %1533 = vmatpush1.bf16.msra.mxu1 %v3617_v23  ;;  %v4010_v23 = vld [vmem:[#allocation4 + $0x28] ss:$16 sps:$4 sm:$0xff]  }
  0xca   :  { %1453 = vmatmul.mubr.bf16.vlgmr.msra.gmra.mrb[4].mxu0 %v4507_v10  ;;  %1543 = vmatprep.subr.bf16.mxu1 %v3626_v28  ;;  %v4016_v28 = vld [vmem:[#allocation4 + $0x48] ss:$16 sps:$4 sm:$0xff]  }
  0xcb   :  { %1462 = vmatpush1.bf16.msra.mxu0 %v3623_v46  ;;  %1493 = vmatprep.mubr.bf16.mxu0 %v4439_v25  ;;  %v4007_v46 = vld [vmem:[#allocation4 + $0x20] ss:$16 sps:$4 sm:$0xff]  }
  0xcc   :  { %1463 = vmatprep.subr.bf16.mxu0 %v3632_v27  ;;  %1535 = vmatmul.mubr.bf16.vlgmr.msra.gmra.mrb[4].mxu1 %v4507_v10  ;;  %v3656_v10 = vcombine.high %v213_v38, %v217_v39  ;;  %v4021_v27 = vld [vmem:[#allocation4 + $0x64] ss:$16 sps:$4 sm:$0xff]   ;;  %v4034_v39 = vld [vmem:[#allocation4 + $0xa8] ss:$16 sps:$4 sm:$0xff]  }
  0xcd   :  { %1544 = vmatpush1.bf16.msra.mxu1 %v3625_v32  ;;  %1575 = vmatprep.mubr.bf16.mxu1 %v4439_v25  ;;  %v3658_v25 = vcombine.high %v214_v52, %v218_v53  ;;  %v4022_v32 = vld [vmem:[#allocation4 + $0x68] ss:$16 sps:$4 sm:$0xff]   ;;  %v4039_v38 = vld [vmem:[#allocation4 + $0xc4] ss:$16 sps:$4 sm:$0xff]   ;;  %v4055_v53 = vld [vmem:[#allocation4 + $0x120] ss:$16 sps:$4 sm:$0xff]  }
  0xce   :  { %1545 = vmatprep.subr.bf16.mxu1 %v3634_v36  ;;  %v4031_v36 = vld [vmem:[#allocation4 + $0xa0] ss:$16 sps:$4 sm:$0xff]   ;;  %v4052_v52 = vld [vmem:[#allocation4 + $0x108] ss:$16 sps:$4 sm:$0xff]  }
  0xcf   :  { %1464 = vmatpush1.bf16.msra.mxu0 %v3631_v29  ;;  %v4019_v29 = vld [vmem:[#allocation4 + $0x60] ss:$16 sps:$4 sm:$0xff]  }
  0xd0   :  { %1465 = vmatprep.subr.bf16.mxu0 %v3640_v35  ;;  %v4028_v35 = vld [vmem:[#allocation4 + $0x88] ss:$16 sps:$4 sm:$0xff]  }
  0xd1   :  { %1546 = vmatpush1.bf16.msra.mxu1 %v3633_v40  ;;  %v4037_v40 = vld [vmem:[#allocation4 + $0xc0] ss:$16 sps:$4 sm:$0xff]  }
  0xd2   :  { %1547 = vmatprep.subr.bf16.mxu1 %v3642_v43  ;;  %v4040_v43 = vld [vmem:[#allocation4 + $0xc8] ss:$16 sps:$4 sm:$0xff]  }
  0xd3   :  { %1466 = vmatpush1.bf16.msra.mxu0 %v3639_v37  ;;  %v4036_v37 = vld [vmem:[#allocation4 + $0xac] ss:$16 sps:$4 sm:$0xff]  }
  0xd4   :  { %1467 = vmatprep.subr.bf16.mxu0 %v3648_v42  ;;  %v4045_v42 = vld [vmem:[#allocation4 + $0xe4] ss:$16 sps:$4 sm:$0xff]  }
  0xd5   :  { %1548 = vmatpush1.bf16.msra.mxu1 %v3641_v48  ;;  %v4051_v48 = vld [vmem:[#allocation4 + $0x104] ss:$16 sps:$4 sm:$0xff]  }
  0xd6   :  { %1549 = vmatprep.subr.bf16.mxu1 %v3650_v50  ;;  %v4054_v50 = vld [vmem:[#allocation4 + $0x10c] ss:$16 sps:$4 sm:$0xff]  }
  0xd7   :  { %1468 = vmatpush1.bf16.msra.mxu0 %v3647_v45  ;;  %v4048_v45 = vld [vmem:[#allocation4 + $0xec] ss:$16 sps:$4 sm:$0xff]  }
  0xd8   :  { %1469 = vmatprep.subr.bf16.mxu0 %v3656_v10  ;;  %v4046_v10 = vld [vmem:[#allocation4 + $0xe8] ss:$16 sps:$4 sm:$0xff]  }
  0xd9   :  { %1550 = vmatpush1.bf16.msra.mxu1 %v3649_v54  ;;  %v4063_v54 = vld [vmem:[#allocation4 + $0x144] ss:$16 sps:$4 sm:$0xff]  }
  0xda   :  { %1551 = vmatprep.subr.bf16.mxu1 %v3658_v25  ;;  %v4066_v25 = vld [vmem:[#allocation4 + $0x14c] ss:$16 sps:$4 sm:$0xff]  }
  0xdb   :  { %1470 = vmatpush1.bf16.msra.mxu0 %v3655_v47  ;;  %v4060_v47 = vld [vmem:[#allocation4 + $0x12c] ss:$16 sps:$4 sm:$0xff]  }
  0xdc   :  { %1471 = vmatprep.subr.bf16.mxu0 %v3664_v55  ;;  %v4058_v55 = vld [vmem:[#allocation4 + $0x128] ss:$16 sps:$4 sm:$0xff]  }
  0xdd   :  { %1552 = vmatpush1.bf16.msra.mxu1 %v3657_v61  ;;  %v4075_v61 = vld [vmem:[#allocation4 + $0x184] ss:$16 sps:$4 sm:$0xff]  }
  0xde   :  { %1553 = vmatprep.subr.bf16.mxu1 %v3666_v0  ;;  %v4078_v0 = vld [vmem:[#allocation4 + $0x18c] ss:$16 sps:$4 sm:$0xff]  }
  0xdf   :  { %1472 = vmatpush1.bf16.msra.mxu0 %v3663_v60  ;;  %v4072_v60 = vld [vmem:[#allocation4 + $0x16c] ss:$16 sps:$4 sm:$0xff]  }
  0xe0   :  { %1473 = vmatprep.subr.bf16.mxu0 %v3672_v62  ;;  %v4070_v62 = vld [vmem:[#allocation4 + $0x168] ss:$16 sps:$4 sm:$0xff]  }
  0xe1   :  { %1554 = vmatpush1.bf16.msra.mxu1 %v3665_v5  ;;  %v4087_v5 = vld [vmem:[#allocation4 + $0x1c4] ss:$16 sps:$4 sm:$0xff]  }
  0xe2   :  { %1555 = vmatprep.subr.bf16.mxu1 %v3674_v7  ;;  %v4085_v7 = vld [vmem:[#allocation4 + $0x1c0] ss:$16 sps:$4 sm:$0xff]  }
  0xe3   :  { %1474 = vmatpush1.bf16.msra.mxu0 %v3671_v4  ;;  %v4084_v4 = vld [vmem:[#allocation4 + $0x1ac] ss:$16 sps:$4 sm:$0xff]  }
  0xe4   :  { %1475 = vmatprep.subr.bf16.mxu0 %v3680_v6  ;;  %v4082_v6 = vld [vmem:[#allocation4 + $0x1a8] ss:$16 sps:$4 sm:$0xff]  }
  0xe5   :  { %1556 = vmatpush1.bf16.msra.mxu1 %v3673_v13  ;;  %v4091_v13 = vld [vmem:[#allocation4 + $0x1e0] ss:$16 sps:$4 sm:$0xff]  }
  0xe6   :  { %1557 = vmatprep.subr.bf16.mxu1 %v3682_v14  ;;  %v4096_v14 = vld [vmem:[#allocation4 + $0x1ec] ss:$16 sps:$4 sm:$0xff]  }
  0xe7   :  { %1476 = vmatpush1.bf16.msra.mxu0 %v3679_v12  ;;  %v4088_v12 = vld [vmem:[#allocation4 + $0x1c8] ss:$16 sps:$4 sm:$0xff]  }
  0xe8   :  { %3150 = vmatprep.subr.bf16.mxu0 %v4003_v15  ;;  %v4099_v15 = vld [vmem:[#allocation4 + $0x204] ss:$16 sps:$4 sm:$0xff]  }
  0xe9   :  { %1558 = vmatpush1.bf16.msra.mxu1 %v3681_v16  ;;  %v4094_v16 = vld [vmem:[#allocation4 + $0x1e8] ss:$16 sps:$4 sm:$0xff]  }
  0xea   :  { %1494 = vmatmul.mubr.bf16.vlgmr.msra.gmra.mrb[4].mxu0 %v4516_v11  ;;  %3314 = vmatprep.subr.bf16.mxu1 %v4006_v18  ;;  %v245_v18 = vlaneseq }
  0xeb   :  { %3151 = vmatpush1.bf16.msra.mxu0 %v4001_v17  ;;  %v4102_v17 = vld [vmem:[#allocation4 + $0x20c] ss:$16 sps:$4 sm:$0xff]  }
  0xec   :  { %3152 = vmatprep.subr.bf16.mxu0 %v4009_v19  ;;  %1576 = vmatmul.mubr.bf16.vlgmr.msra.gmra.mrb[4].mxu1 %v4516_v11  ;;  %v4025_v11 = vld [vmem:[#allocation4 + $0x80] ss:$16 sps:$4 sm:$0xff]   ;;  %v4528_v19 = vshrl.u32 %v245_v18, 7  ;;  %v4160_v18 = vld [vmem:[#allocation4 + $0x348] ss:$16 sps:$4 sm:$0xff]  }
  0xed   :  { %3315 = vmatpush1.bf16.msra.mxu1 %v4004_v20 }
  0xee   :  { %3316 = vmatprep.subr.bf16.mxu1 %v4012_v21  ;;  %v247_v20 = vsub.s32 0, %v4528_v19  ;;  %v251_v21 = vsub.s32 1, %v4528_v19 }
  0xef   :  { %3153 = vmatpush1.bf16.msra.mxu0 %v4007_v46  ;;  %v4534_v46 = vld [vmem:[%s4596_s2] sm:$0xff] }
  0xf0   :  { %3154 = vmatprep.subr.bf16.mxu0 %v4015_v22  ;;  %v248_v22 = vrot.slane %v4534_v46, %v247_v20 }
  0xf1   :  { %3317 = vmatpush1.bf16.msra.mxu1 %v4010_v23  ;;  %v252_v23 = vrot.slane %v4534_v46, %v251_v21 }
  0xf2   :  { %3318 = vmatprep.subr.bf16.mxu1 %v4018_v26 }
  0xf3   :  { %3155 = vmatpush1.bf16.msra.mxu0 %v4013_v24  ;;  %v259_v24 = vsub.s32 3, %v4528_v19 }
  0xf4   :  { %3156 = vmatprep.subr.bf16.mxu0 %v4021_v27 }
  0xf5   :  { %3319 = vmatpush1.bf16.msra.mxu1 %v4016_v28 }
  0xf6   :  { %3320 = vmatprep.subr.bf16.mxu1 %v4024_v30 }
  0xf7   :  { %3157 = vmatpush1.bf16.msra.mxu0 %v4019_v29 }
  0xf8   :  { %3158 = vmatprep.subr.bf16.mxu0 %v4027_v31  ;;  %v260_v31 = vrot.slane %v4534_v46, %v259_v24 }
  0xf9   :  { %3321 = vmatpush1.bf16.msra.mxu1 %v4022_v32 }
  0xfa   :  { %3322 = vmatprep.subr.bf16.mxu1 %v4030_v33  ;;  %v4097_v33 = vld [vmem:[#allocation4 + $0x200] ss:$16 sps:$4 sm:$0xff]  }
  0xfb   :  { %3159 = vmatpush1.bf16.msra.mxu0 %v4025_v11 }
  0xfc   :  { %3160 = vmatprep.subr.bf16.mxu0 %v4033_v34  ;;  %v4100_v34 = vld [vmem:[#allocation4 + $0x208] ss:$16 sps:$4 sm:$0xff]  }
  0xfd   :  { %3323 = vmatpush1.bf16.msra.mxu1 %v4028_v35 }
  0xfe   :  { %3324 = vmatprep.subr.bf16.mxu1 %v4036_v37  ;;  %v4105_v37 = vld [vmem:[#allocation4 + $0x224] ss:$16 sps:$4 sm:$0xff]  }
  0xff   :  { %3161 = vmatpush1.bf16.msra.mxu0 %v4031_v36 }
 0x100   :  { %3162 = vmatprep.subr.bf16.mxu0 %v4039_v38  ;;  %v4108_v38 = vld [vmem:[#allocation4 + $0x22c] ss:$16 sps:$4 sm:$0xff]  }
 0x101   :  { %3325 = vmatpush1.bf16.msra.mxu1 %v4034_v39 }
 0x102   :  { %3326 = vmatprep.subr.bf16.mxu1 %v4042_v41 }
 0x103   :  { %3163 = vmatpush1.bf16.msra.mxu0 %v4037_v40 }
 0x104   :  { %3164 = vmatprep.subr.bf16.mxu0 %v4045_v42 }
 0x105   :  { %3327 = vmatpush1.bf16.msra.mxu1 %v4040_v43  ;;  %v4103_v43 = vld [vmem:[#allocation4 + $0x220] ss:$16 sps:$4 sm:$0xff]  }
 0x106   :  { %3328 = vmatprep.subr.bf16.mxu1 %v4048_v45 }
 0x107   :  { %3165 = vmatpush1.bf16.msra.mxu0 %v4043_v44  ;;  %v4106_v44 = vld [vmem:[#allocation4 + $0x228] ss:$16 sps:$4 sm:$0xff]  }
 0x108   :  { %3166 = vmatprep.subr.bf16.mxu0 %v4051_v48  ;;  %v4111_v48 = vld [vmem:[#allocation4 + $0x244] ss:$16 sps:$4 sm:$0xff]  }
 0x109   :  { %3329 = vmatpush1.bf16.msra.mxu1 %v4046_v10  ;;  %v4114_v10 = vld [vmem:[#allocation4 + $0x24c] ss:$16 sps:$4 sm:$0xff]  }
 0x10a   :  { %3330 = vmatprep.subr.bf16.mxu1 %v4054_v50  ;;  %v4112_v50 = vld [vmem:[#allocation4 + $0x248] ss:$16 sps:$4 sm:$0xff]  }
 0x10b   :  { %3167 = vmatpush1.bf16.msra.mxu0 %v4049_v49  ;;  %v4109_v49 = vld [vmem:[#allocation4 + $0x240] ss:$16 sps:$4 sm:$0xff]  }
 0x10c   :  { %3168 = vmatprep.subr.bf16.mxu0 %v4057_v51  ;;  %v4117_v51 = vld [vmem:[#allocation4 + $0x264] ss:$16 sps:$4 sm:$0xff]  }
 0x10d   :  { %3331 = vmatpush1.bf16.msra.mxu1 %v4052_v52  ;;  %v4120_v52 = vld [vmem:[#allocation4 + $0x26c] ss:$16 sps:$4 sm:$0xff]  }
 0x10e   :  { %3332 = vmatprep.subr.bf16.mxu1 %v4060_v47  ;;  %v4118_v47 = vld [vmem:[#allocation4 + $0x268] ss:$16 sps:$4 sm:$0xff]  }
 0x10f   :  { %3169 = vmatpush1.bf16.msra.mxu0 %v4055_v53  ;;  %v4115_v53 = vld [vmem:[#allocation4 + $0x260] ss:$16 sps:$4 sm:$0xff]  }
 0x110   :  { %3170 = vmatprep.subr.bf16.mxu0 %v4063_v54  ;;  %v4123_v54 = vld [vmem:[#allocation4 + $0x284] ss:$16 sps:$4 sm:$0xff]  }
 0x111   :  { %3333 = vmatpush1.bf16.msra.mxu1 %v4058_v55  ;;  %v4126_v55 = vld [vmem:[#allocation4 + $0x28c] ss:$16 sps:$4 sm:$0xff]  }
 0x112   :  { %3334 = vmatprep.subr.bf16.mxu1 %v4066_v25  ;;  %v4124_v25 = vld [vmem:[#allocation4 + $0x288] ss:$16 sps:$4 sm:$0xff]  }
 0x113   :  { %3171 = vmatpush1.bf16.msra.mxu0 %v4061_v56  ;;  %v4121_v56 = vld [vmem:[#allocation4 + $0x280] ss:$16 sps:$4 sm:$0xff]  }
 0x114   :  { %3172 = vmatprep.subr.bf16.mxu0 %v4069_v57  ;;  %v4129_v57 = vld [vmem:[#allocation4 + $0x2a4] ss:$16 sps:$4 sm:$0xff]  }
 0x115   :  { %3335 = vmatpush1.bf16.msra.mxu1 %v4064_v58  ;;  %v4132_v58 = vld [vmem:[#allocation4 + $0x2ac] ss:$16 sps:$4 sm:$0xff]  }
 0x116   :  { %3336 = vmatprep.subr.bf16.mxu1 %v4072_v60  ;;  %v4130_v60 = vld [vmem:[#allocation4 + $0x2a8] ss:$16 sps:$4 sm:$0xff]  }
 0x117   :  { %3173 = vmatpush1.bf16.msra.mxu0 %v4067_v59  ;;  %v4127_v59 = vld [vmem:[#allocation4 + $0x2a0] ss:$16 sps:$4 sm:$0xff]  }
 0x118   :  { %3174 = vmatprep.subr.bf16.mxu0 %v4075_v61  ;;  %v4135_v61 = vld [vmem:[#allocation4 + $0x2c4] ss:$16 sps:$4 sm:$0xff]  }
 0x119   :  { %3337 = vmatpush1.bf16.msra.mxu1 %v4070_v62  ;;  %v4138_v62 = vld [vmem:[#allocation4 + $0x2cc] ss:$16 sps:$4 sm:$0xff]  }
 0x11a   :  { %3338 = vmatprep.subr.bf16.mxu1 %v4078_v0  ;;  %v4136_v0 = vld [vmem:[#allocation4 + $0x2c8] ss:$16 sps:$4 sm:$0xff]  }
 0x11b   :  { %3175 = vmatpush1.bf16.msra.mxu0 %v4073_v63  ;;  %v4133_v63 = vld [vmem:[#allocation4 + $0x2c0] ss:$16 sps:$4 sm:$0xff]  }
 0x11c   :  { %3176 = vmatprep.subr.bf16.mxu0 %v4081_v1  ;;  %v4141_v1 = vld [vmem:[#allocation4 + $0x2e4] ss:$16 sps:$4 sm:$0xff]  }
 0x11d   :  { %3339 = vmatpush1.bf16.msra.mxu1 %v4076_v2  ;;  %v4144_v2 = vld [vmem:[#allocation4 + $0x2ec] ss:$16 sps:$4 sm:$0xff]  }
 0x11e   :  { %3340 = vmatprep.subr.bf16.mxu1 %v4084_v4  ;;  %v4142_v4 = vld [vmem:[#allocation4 + $0x2e8] ss:$16 sps:$4 sm:$0xff]  }
 0x11f   :  { %3177 = vmatpush1.bf16.msra.mxu0 %v4079_v3  ;;  %v4139_v3 = vld [vmem:[#allocation4 + $0x2e0] ss:$16 sps:$4 sm:$0xff]  }
 0x120   :  { %3178 = vmatprep.subr.bf16.mxu0 %v4087_v5  ;;  %v4147_v5 = vld [vmem:[#allocation4 + $0x304] ss:$16 sps:$4 sm:$0xff]  }
 0x121   :  { %3341 = vmatpush1.bf16.msra.mxu1 %v4082_v6  ;;  %v4150_v6 = vld [vmem:[#allocation4 + $0x30c] ss:$16 sps:$4 sm:$0xff]  }
 0x122   :  { %3342 = vmatprep.subr.bf16.mxu1 %v4090_v8  ;;  %v4148_v8 = vld [vmem:[#allocation4 + $0x308] ss:$16 sps:$4 sm:$0xff]  }
 0x123   :  { %3179 = vmatpush1.bf16.msra.mxu0 %v4085_v7  ;;  %v4145_v7 = vld [vmem:[#allocation4 + $0x300] ss:$16 sps:$4 sm:$0xff]  }
 0x124   :  { %3180 = vmatprep.subr.bf16.mxu0 %v4093_v9  ;;  %v4153_v9 = vld [vmem:[#allocation4 + $0x324] ss:$16 sps:$4 sm:$0xff]  }
 0x125   :  { %3343 = vmatpush1.bf16.msra.mxu1 %v4088_v12  ;;  %v4156_v12 = vld [vmem:[#allocation4 + $0x32c] ss:$16 sps:$4 sm:$0xff]  }
 0x126   :  { %3344 = vmatprep.subr.bf16.mxu1 %v4096_v14  ;;  %v4154_v14 = vld [vmem:[#allocation4 + $0x328] ss:$16 sps:$4 sm:$0xff]  }
 0x127   :  { %3181 = vmatpush1.bf16.msra.mxu0 %v4091_v13  ;;  %v4151_v13 = vld [vmem:[#allocation4 + $0x320] ss:$16 sps:$4 sm:$0xff]  }
 0x128   :  { %3191 = vmatprep.subr.bf16.mxu0 %v4099_v15  ;;  %v4159_v15 = vld [vmem:[#allocation4 + $0x344] ss:$16 sps:$4 sm:$0xff]  }
 0x129   :  { %3345 = vmatpush1.bf16.msra.mxu1 %v4094_v16  ;;  %v4162_v16 = vld [vmem:[#allocation4 + $0x34c] ss:$16 sps:$4 sm:$0xff]  }
 0x12a   :  { %3355 = vmatprep.subr.bf16.mxu1 %v4102_v17  ;;  %v4157_v17 = vld [vmem:[#allocation4 + $0x340] ss:$16 sps:$4 sm:$0xff]  }
 0x15d   :  { %v1331_v26 = vpop.f32.mrb[0].mxu0 }
 0x15e   :  { %v3939_v27 = vadd.f32 %v1331_v26, %v248_v22  ;;  %v1333_v28 = vpop.f32.mrb[1].mxu0  ;;  %v4165_v22 = vld [vmem:[#allocation4 + $0x364] ss:$16 sps:$4 sm:$0xff]   ;;  %v4163_v26 = vld [vmem:[#allocation4 + $0x360] ss:$16 sps:$4 sm:$0xff]  }
 0x15f   :  { %v3940_v29 = vadd.f32 %v1333_v28, %v252_v23  ;;  %v1335_v30 = vpop.f32.mrb[2].mxu0  ;;  %v4547_v35 = vpop.f32.mrb[0].mxu1  ;;  %v4168_v23 = vld [vmem:[#allocation4 + $0x36c] ss:$16 sps:$4 sm:$0xff]   ;;  %v4171_v28 = vld [vmem:[#allocation4 + $0x384] ss:$16 sps:$4 sm:$0xff]  }
 0x160   :  { %v1336_v32 = vpop.f32.mrb[3].mxu0  ;;  %v1584_v36 = vpack.c.bf16 %v3939_v27, %v3939_v27  ;;  %v1415_v39 = vpop.f32.mrb[1].mxu1  ;;  %v4166_v27 = vld [vmem:[#allocation4 + $0x368] ss:$16 sps:$4 sm:$0xff]   ;;  %v4169_v30 = vld [vmem:[#allocation4 + $0x380] ss:$16 sps:$4 sm:$0xff]  }
 0x161   :  { %v1585_v11 = vpack.c.bf16 %v3940_v29, %v3940_v29  ;;  %v3942_v40 = vadd.f32 %v1415_v39, %v260_v31  ;;  %v1417_v41 = vpop.f32.mrb[2].mxu1  ;;  %v4174_v29 = vld [vmem:[#allocation4 + $0x38c] ss:$16 sps:$4 sm:$0xff]   ;;  %v4172_v31 = vld [vmem:[#allocation4 + $0x388] ss:$16 sps:$4 sm:$0xff]  }
 0x162   :  { %v1418_v42 = vpop.f32.mrb[3].mxu1  ;;  %v4177_v32 = vld [vmem:[#allocation4 + $0x3a4] ss:$16 sps:$4 sm:$0xff]   ;;  %v4181_v39 = vld [vmem:[#allocation4 + $0x3c0] ss:$16 sps:$4 sm:$0xff]  }
 0x163   :  { %3182 = vmatprep.mubr.bf16.mxu0 %v1585_v11  ;;  %3346 = vmatprep.mubr.bf16.mxu1 %v1585_v11  ;;  %v1587_v45 = vpack.c.bf16 %v3942_v40, %v3942_v40  ;;  %v4180_v11 = vld [vmem:[#allocation4 + $0x3ac] ss:$16 sps:$4 sm:$0xff]   ;;  %v4184_v40 = vld [vmem:[#allocation4 + $0x3c8] ss:$16 sps:$4 sm:$0xff]   ;;  %v4189_v42 = vld [vmem:[#allocation4 + $0x3e4] ss:$16 sps:$4 sm:$0xff]  }
 0x164   :  { %3183 = vmatmul.mubr.bf16.vlgmr.msra.gmra.mrb[8].mxu0 %v1584_v36  ;;  %3347 = vmatmul.mubr.bf16.vlgmr.msra.gmra.mrb[8].mxu1 %v1584_v36  ;;  %v255_v36 = vsub.s32 2, %v4528_v19 }
 0x165   :  { %3192 = vmatpush1.bf16.msra.mxu0 %v4097_v33  ;;  %3356 = vmatpush1.bf16.msra.mxu1 %v4100_v34  ;;  %v4175_v33 = vld [vmem:[#allocation4 + $0x3a0] ss:$16 sps:$4 sm:$0xff]   ;;  %v4178_v34 = vld [vmem:[#allocation4 + $0x3a8] ss:$16 sps:$4 sm:$0xff]  }
 0x166   :  { %3193 = vmatprep.subr.bf16.mxu0 %v4105_v37  ;;  %3357 = vmatprep.subr.bf16.mxu1 %v4108_v38  ;;  %v4183_v37 = vld [vmem:[#allocation4 + $0x3c4] ss:$16 sps:$4 sm:$0xff]   ;;  %v4186_v38 = vld [vmem:[#allocation4 + $0x3cc] ss:$16 sps:$4 sm:$0xff]   ;;  %v256_v41 = vrot.slane %v4534_v46, %v255_v36 }
 0x167   :  { %3223 = vmatprep.mubr.bf16.mxu0 %v1587_v45  ;;  %3387 = vmatprep.mubr.bf16.mxu1 %v1587_v45  ;;  %v4190_v45 = vld [vmem:[#allocation4 + $0x3e8] ss:$16 sps:$4 sm:$0xff]  }
 0x169   :  { %3194 = vmatpush1.bf16.msra.mxu0 %v4103_v43  ;;  %3358 = vmatpush1.bf16.msra.mxu1 %v4106_v44  ;;  %v4192_v43 = vld [vmem:[#allocation4 + $0x3ec] ss:$16 sps:$4 sm:$0xff]   ;;  %v4187_v44 = vld [vmem:[#allocation4 + $0x3e0] ss:$16 sps:$4 sm:$0xff]  }
 0x16a   :  { %3195 = vmatprep.subr.bf16.mxu0 %v4111_v48  ;;  %3359 = vmatprep.subr.bf16.mxu1 %v4114_v10  ;;  %v3941_v48 = vadd.f32 %v4547_v35, %v256_v41  ;;  %v4195_v10 = vld [vmem:[#allocation4 + $0x404] ss:$16 sps:$4 sm:$0xff]   ;;  %v4250_v41 = vld [vmem:[#allocation4 + $0x528] ss:$16 sps:$4 sm:$0xff]  }
 0x16b   :  { %v4207_v35 = vld [vmem:[#allocation4 + $0x444] ss:$16 sps:$4 sm:$0xff]  }
 0x16d   :  { %3196 = vmatpush1.bf16.msra.mxu0 %v4109_v49  ;;  %3360 = vmatpush1.bf16.msra.mxu1 %v4112_v50  ;;  %v4198_v49 = vld [vmem:[#allocation4 + $0x40c] ss:$16 sps:$4 sm:$0xff]   ;;  %v4193_v50 = vld [vmem:[#allocation4 + $0x400] ss:$16 sps:$4 sm:$0xff]  }
 0x16e   :  { %3197 = vmatprep.subr.bf16.mxu0 %v4117_v51  ;;  %3361 = vmatprep.subr.bf16.mxu1 %v4120_v52  ;;  %v4196_v51 = vld [vmem:[#allocation4 + $0x408] ss:$16 sps:$4 sm:$0xff]   ;;  %v1586_v52 = vpack.c.bf16 %v3941_v48, %v3941_v48  ;;  %v4261_v48 = vld [vmem:[#allocation4 + $0x564] ss:$16 sps:$4 sm:$0xff]  }
 0x171   :  { %3198 = vmatpush1.bf16.msra.mxu0 %v4115_v53  ;;  %3362 = vmatpush1.bf16.msra.mxu1 %v4118_v47  ;;  %v4201_v53 = vld [vmem:[#allocation4 + $0x424] ss:$16 sps:$4 sm:$0xff]   ;;  %v4204_v47 = vld [vmem:[#allocation4 + $0x42c] ss:$16 sps:$4 sm:$0xff]  }
 0x172   :  { %3199 = vmatprep.subr.bf16.mxu0 %v4123_v54  ;;  %3363 = vmatprep.subr.bf16.mxu1 %v4126_v55  ;;  %v4199_v54 = vld [vmem:[#allocation4 + $0x420] ss:$16 sps:$4 sm:$0xff]   ;;  %v4202_v55 = vld [vmem:[#allocation4 + $0x428] ss:$16 sps:$4 sm:$0xff]  }
 0x175   :  { %3200 = vmatpush1.bf16.msra.mxu0 %v4121_v56  ;;  %3364 = vmatpush1.bf16.msra.mxu1 %v4124_v25  ;;  %v4210_v56 = vld [vmem:[#allocation4 + $0x44c] ss:$16 sps:$4 sm:$0xff]   ;;  %v4205_v25 = vld [vmem:[#allocation4 + $0x440] ss:$16 sps:$4 sm:$0xff]  }
 0x176   :  { %3201 = vmatprep.subr.bf16.mxu0 %v4129_v57  ;;  %3365 = vmatprep.subr.bf16.mxu1 %v4132_v58  ;;  %v4208_v57 = vld [vmem:[#allocation4 + $0x448] ss:$16 sps:$4 sm:$0xff]   ;;  %v4213_v58 = vld [vmem:[#allocation4 + $0x464] ss:$16 sps:$4 sm:$0xff]  }
 0x179   :  { %3202 = vmatpush1.bf16.msra.mxu0 %v4127_v59  ;;  %3366 = vmatpush1.bf16.msra.mxu1 %v4130_v60  ;;  %v4216_v59 = vld [vmem:[#allocation4 + $0x46c] ss:$16 sps:$4 sm:$0xff]   ;;  %v4211_v60 = vld [vmem:[#allocation4 + $0x460] ss:$16 sps:$4 sm:$0xff]  }
 0x17a   :  { %3203 = vmatprep.subr.bf16.mxu0 %v4135_v61  ;;  %3367 = vmatprep.subr.bf16.mxu1 %v4138_v62  ;;  %v4214_v61 = vld [vmem:[#allocation4 + $0x468] ss:$16 sps:$4 sm:$0xff]   ;;  %v4219_v62 = vld [vmem:[#allocation4 + $0x484] ss:$16 sps:$4 sm:$0xff]  }
 0x17d   :  { %3204 = vmatpush1.bf16.msra.mxu0 %v4133_v63  ;;  %3368 = vmatpush1.bf16.msra.mxu1 %v4136_v0  ;;  %v4222_v63 = vld [vmem:[#allocation4 + $0x48c] ss:$16 sps:$4 sm:$0xff]   ;;  %v4217_v0 = vld [vmem:[#allocation4 + $0x480] ss:$16 sps:$4 sm:$0xff]  }
 0x17e   :  { %3205 = vmatprep.subr.bf16.mxu0 %v4141_v1  ;;  %3369 = vmatprep.subr.bf16.mxu1 %v4144_v2  ;;  %v4220_v1 = vld [vmem:[#allocation4 + $0x488] ss:$16 sps:$4 sm:$0xff]   ;;  %v4225_v2 = vld [vmem:[#allocation4 + $0x4a4] ss:$16 sps:$4 sm:$0xff]  }
 0x181   :  { %3206 = vmatpush1.bf16.msra.mxu0 %v4139_v3  ;;  %3370 = vmatpush1.bf16.msra.mxu1 %v4142_v4  ;;  %v4228_v3 = vld [vmem:[#allocation4 + $0x4ac] ss:$16 sps:$4 sm:$0xff]   ;;  %v4223_v4 = vld [vmem:[#allocation4 + $0x4a0] ss:$16 sps:$4 sm:$0xff]  }
 0x182   :  { %3207 = vmatprep.subr.bf16.mxu0 %v4147_v5  ;;  %3371 = vmatprep.subr.bf16.mxu1 %v4150_v6  ;;  %v4226_v5 = vld [vmem:[#allocation4 + $0x4a8] ss:$16 sps:$4 sm:$0xff]   ;;  %v4231_v6 = vld [vmem:[#allocation4 + $0x4c4] ss:$16 sps:$4 sm:$0xff]  }
 0x185   :  { %3208 = vmatpush1.bf16.msra.mxu0 %v4145_v7  ;;  %3372 = vmatpush1.bf16.msra.mxu1 %v4148_v8  ;;  %v4234_v7 = vld [vmem:[#allocation4 + $0x4cc] ss:$16 sps:$4 sm:$0xff]   ;;  %v267_v8 = vsub.s32 5, %v4528_v19 }
 0x186   :  { %3209 = vmatprep.subr.bf16.mxu0 %v4153_v9  ;;  %3373 = vmatprep.subr.bf16.mxu1 %v4156_v12  ;;  %v4229_v9 = vld [vmem:[#allocation4 + $0x4c0] ss:$16 sps:$4 sm:$0xff]   ;;  %v4232_v12 = vld [vmem:[#allocation4 + $0x4c8] ss:$16 sps:$4 sm:$0xff]  }
 0x189   :  { %3210 = vmatpush1.bf16.msra.mxu0 %v4151_v13  ;;  %3374 = vmatpush1.bf16.msra.mxu1 %v4154_v14  ;;  %v4237_v13 = vld [vmem:[#allocation4 + $0x4e4] ss:$16 sps:$4 sm:$0xff]   ;;  %v4240_v14 = vld [vmem:[#allocation4 + $0x4ec] ss:$16 sps:$4 sm:$0xff]  }
 0x18a   :  { %3211 = vmatprep.subr.bf16.mxu0 %v4159_v15  ;;  %3375 = vmatprep.subr.bf16.mxu1 %v4162_v16  ;;  %v268_v15 = vrot.slane %v4534_v46, %v267_v8  ;;  %v4289_v8 = vld [vmem:[#allocation4 + $0x600] ss:$16 sps:$4 sm:$0xff]  }
 0x18d   :  { %3212 = vmatpush1.bf16.msra.mxu0 %v4157_v17  ;;  %3376 = vmatpush1.bf16.msra.mxu1 %v4160_v18  ;;  %v4235_v17 = vld [vmem:[#allocation4 + $0x4e0] ss:$16 sps:$4 sm:$0xff]   ;;  %v4238_v18 = vld [vmem:[#allocation4 + $0x4e8] ss:$16 sps:$4 sm:$0xff]  }
 0x18e   :  { %3213 = vmatprep.subr.bf16.mxu0 %v4165_v22  ;;  %3377 = vmatprep.subr.bf16.mxu1 %v4168_v23  ;;  %v4243_v23 = vld [vmem:[#allocation4 + $0x504] ss:$16 sps:$4 sm:$0xff]  }
 0x191   :  { %3214 = vmatpush1.bf16.msra.mxu0 %v4163_v26  ;;  %3378 = vmatpush1.bf16.msra.mxu1 %v4166_v27  ;;  %v4246_v26 = vld [vmem:[#allocation4 + $0x50c] ss:$16 sps:$4 sm:$0xff]  }
 0x192   :  { %3215 = vmatprep.subr.bf16.mxu0 %v4171_v28  ;;  %3379 = vmatprep.subr.bf16.mxu1 %v4174_v29 }
 0x195   :  { %3216 = vmatpush1.bf16.msra.mxu0 %v4169_v30  ;;  %3380 = vmatpush1.bf16.msra.mxu1 %v4172_v31  ;;  %v4241_v31 = vld [vmem:[#allocation4 + $0x500] ss:$16 sps:$4 sm:$0xff]  }
 0x196   :  { %3217 = vmatprep.subr.bf16.mxu0 %v4177_v32  ;;  %3381 = vmatprep.subr.bf16.mxu1 %v4180_v11  ;;  %v4244_v32 = vld [vmem:[#allocation4 + $0x508] ss:$16 sps:$4 sm:$0xff]  }
 0x199   :  { %3218 = vmatpush1.bf16.msra.mxu0 %v4175_v33  ;;  %3382 = vmatpush1.bf16.msra.mxu1 %v4178_v34  ;;  %v4249_v33 = vld [vmem:[#allocation4 + $0x524] ss:$16 sps:$4 sm:$0xff]   ;;  %v4252_v34 = vld [vmem:[#allocation4 + $0x52c] ss:$16 sps:$4 sm:$0xff]  }
 0x19a   :  { %3219 = vmatprep.subr.bf16.mxu0 %v4183_v37  ;;  %3383 = vmatprep.subr.bf16.mxu1 %v4186_v38 }
 0x19d   :  { %3220 = vmatpush1.bf16.msra.mxu0 %v4181_v39  ;;  %3384 = vmatpush1.bf16.msra.mxu1 %v4184_v40  ;;  %v4247_v40 = vld [vmem:[#allocation4 + $0x520] ss:$16 sps:$4 sm:$0xff]  }
 0x19e   :  { %3221 = vmatprep.subr.bf16.mxu0 %v4189_v42  ;;  %3385 = vmatprep.subr.bf16.mxu1 %v4192_v43  ;;  %v4255_v42 = vld [vmem:[#allocation4 + $0x544] ss:$16 sps:$4 sm:$0xff]   ;;  %v4258_v43 = vld [vmem:[#allocation4 + $0x54c] ss:$16 sps:$4 sm:$0xff]  }
 0x1a1   :  { %3222 = vmatpush1.bf16.msra.mxu0 %v4187_v44  ;;  %3386 = vmatpush1.bf16.msra.mxu1 %v4190_v45  ;;  %v4253_v44 = vld [vmem:[#allocation4 + $0x540] ss:$16 sps:$4 sm:$0xff]   ;;  %v4256_v45 = vld [vmem:[#allocation4 + $0x548] ss:$16 sps:$4 sm:$0xff]  }
 0x1a2   :  { %3232 = vmatprep.subr.bf16.mxu0 %v4195_v10  ;;  %3396 = vmatprep.subr.bf16.mxu1 %v4198_v49  ;;  %v4264_v10 = vld [vmem:[#allocation4 + $0x56c] ss:$16 sps:$4 sm:$0xff]   ;;  %v4259_v49 = vld [vmem:[#allocation4 + $0x560] ss:$16 sps:$4 sm:$0xff]  }
 0x1a4   :  { %3224 = vmatmul.mubr.bf16.vlgmr.msra.gmra.mrb[8].mxu0 %v1586_v52  ;;  %3388 = vmatmul.mubr.bf16.vlgmr.msra.gmra.mrb[8].mxu1 %v1586_v52  ;;  %v4270_v52 = vld [vmem:[#allocation4 + $0x58c] ss:$16 sps:$4 sm:$0xff]  }
 0x1a5   :  { %3233 = vmatpush1.bf16.msra.mxu0 %v4193_v50  ;;  %3397 = vmatpush1.bf16.msra.mxu1 %v4196_v51  ;;  %v4262_v50 = vld [vmem:[#allocation4 + $0x568] ss:$16 sps:$4 sm:$0xff]   ;;  %v4267_v51 = vld [vmem:[#allocation4 + $0x584] ss:$16 sps:$4 sm:$0xff]  }
 0x1a6   :  { %3234 = vmatprep.subr.bf16.mxu0 %v4201_v53  ;;  %3398 = vmatprep.subr.bf16.mxu1 %v4204_v47  ;;  %v4265_v53 = vld [vmem:[#allocation4 + $0x580] ss:$16 sps:$4 sm:$0xff]   ;;  %v4268_v47 = vld [vmem:[#allocation4 + $0x588] ss:$16 sps:$4 sm:$0xff]  }
 0x1a9   :  { %3235 = vmatpush1.bf16.msra.mxu0 %v4199_v54  ;;  %3399 = vmatpush1.bf16.msra.mxu1 %v4202_v55  ;;  %v4273_v54 = vld [vmem:[#allocation4 + $0x5a4] ss:$16 sps:$4 sm:$0xff]   ;;  %v4276_v55 = vld [vmem:[#allocation4 + $0x5ac] ss:$16 sps:$4 sm:$0xff]  }
 0x1aa   :  { %3236 = vmatprep.subr.bf16.mxu0 %v4207_v35  ;;  %3400 = vmatprep.subr.bf16.mxu1 %v4210_v56  ;;  %v4271_v35 = vld [vmem:[#allocation4 + $0x5a0] ss:$16 sps:$4 sm:$0xff]   ;;  %v4274_v56 = vld [vmem:[#allocation4 + $0x5a8] ss:$16 sps:$4 sm:$0xff]  }
 0x1ad   :  { %3237 = vmatpush1.bf16.msra.mxu0 %v4205_v25  ;;  %3401 = vmatpush1.bf16.msra.mxu1 %v4208_v57  ;;  %v263_v25 = vsub.s32 4, %v4528_v19  ;;  %v4279_v57 = vld [vmem:[#allocation4 + $0x5c4] ss:$16 sps:$4 sm:$0xff]  }
 0x1ae   :  { %3238 = vmatprep.subr.bf16.mxu0 %v4213_v58  ;;  %3402 = vmatprep.subr.bf16.mxu1 %v4216_v59  ;;  %v4282_v58 = vld [vmem:[#allocation4 + $0x5cc] ss:$16 sps:$4 sm:$0xff]   ;;  %v275_v59 = vsub.s32 7, %v4528_v19 }
 0x1b1   :  { %3239 = vmatpush1.bf16.msra.mxu0 %v4211_v60  ;;  %3403 = vmatpush1.bf16.msra.mxu1 %v4214_v61  ;;  %v4277_v60 = vld [vmem:[#allocation4 + $0x5c0] ss:$16 sps:$4 sm:$0xff]   ;;  %v4280_v61 = vld [vmem:[#allocation4 + $0x5c8] ss:$16 sps:$4 sm:$0xff]  }
 0x1b2   :  { %3240 = vmatprep.subr.bf16.mxu0 %v4219_v62  ;;  %3404 = vmatprep.subr.bf16.mxu1 %v4222_v63  ;;  %v264_v62 = vrot.slane %v4534_v46, %v263_v25  ;;  %v4285_v63 = vld [vmem:[#allocation4 + $0x5e4] ss:$16 sps:$4 sm:$0xff]   ;;  %v4354_v25 = vld [vmem:[#allocation4 + $0x74c] ss:$16 sps:$4 sm:$0xff]  }
 0x1b5   :  { %3241 = vmatpush1.bf16.msra.mxu0 %v4217_v0  ;;  %3405 = vmatpush1.bf16.msra.mxu1 %v4220_v1  ;;  %v4288_v0 = vld [vmem:[#allocation4 + $0x5ec] ss:$16 sps:$4 sm:$0xff]   ;;  %v276_v1 = vrot.slane %v4534_v46, %v275_v59  ;;  %v4357_v59 = vld [vmem:[#allocation4 + $0x764] ss:$16 sps:$4 sm:$0xff]  }
 0x1b6   :  { %3242 = vmatprep.subr.bf16.mxu0 %v4225_v2  ;;  %3406 = vmatprep.subr.bf16.mxu1 %v4228_v3  ;;  %v4283_v2 = vld [vmem:[#allocation4 + $0x5e0] ss:$16 sps:$4 sm:$0xff]   ;;  %v4286_v3 = vld [vmem:[#allocation4 + $0x5e8] ss:$16 sps:$4 sm:$0xff]  }
 0x1b9   :  { %3243 = vmatpush1.bf16.msra.mxu0 %v4223_v4  ;;  %3407 = vmatpush1.bf16.msra.mxu1 %v4226_v5  ;;  %v4291_v5 = vld [vmem:[#allocation4 + $0x604] ss:$16 sps:$4 sm:$0xff]  }
 0x1ba   :  { %3244 = vmatprep.subr.bf16.mxu0 %v4231_v6  ;;  %3408 = vmatprep.subr.bf16.mxu1 %v4234_v7  ;;  %v4294_v6 = vld [vmem:[#allocation4 + $0x60c] ss:$16 sps:$4 sm:$0xff]  }
 0x1bd   :  { %3245 = vmatpush1.bf16.msra.mxu0 %v4229_v9  ;;  %3409 = vmatpush1.bf16.msra.mxu1 %v4232_v12  ;;  %v4556_v16 = vpop.f32.mrb[4].mxu0  ;;  %v4292_v12 = vld [vmem:[#allocation4 + $0x608] ss:$16 sps:$4 sm:$0xff]  }
 0x1be   :  { %v1497_v22 = vpop.f32.mrb[5].mxu0  ;;  %3246 = vmatprep.subr.bf16.mxu0 %v4237_v13  ;;  %3410 = vmatprep.subr.bf16.mxu1 %v4240_v14  ;;  %v3943_v4 = vadd.f32 %v4556_v16, %v264_v62  ;;  %v4297_v14 = vld [vmem:[#allocation4 + $0x624] ss:$16 sps:$4 sm:$0xff]   ;;  %v4295_v16 = vld [vmem:[#allocation4 + $0x620] ss:$16 sps:$4 sm:$0xff]  }
 0x1bf   :  { %v3944_v27 = vadd.f32 %v1497_v22, %v268_v15  ;;  %v1499_v28 = vpop.f32.mrb[6].mxu0  ;;  %v4558_v11 = vpop.f32.mrb[4].mxu1  ;;  %v4300_v15 = vld [vmem:[#allocation4 + $0x62c] ss:$16 sps:$4 sm:$0xff]   ;;  %v4358_v62 = vld [vmem:[#allocation4 + $0x768] ss:$16 sps:$4 sm:$0xff]  }
 0x1c0   :  { %v1500_v29 = vpop.f32.mrb[7].mxu0  ;;  %v4560_v37 = vpop.f32.mrb[5].mxu1  ;;  %v1588_v9 = vpack.c.bf16 %v3943_v4, %v3943_v4  ;;  %v4306_v22 = vld [vmem:[#allocation4 + $0x64c] ss:$16 sps:$4 sm:$0xff]  }
 0x1c1   :  { %v1589_v30 = vpack.c.bf16 %v3944_v27, %v3944_v27  ;;  %3247 = vmatpush1.bf16.msra.mxu0 %v4235_v17  ;;  %3411 = vmatpush1.bf16.msra.mxu1 %v4238_v18  ;;  %v1581_v38 = vpop.f32.mrb[6].mxu1  ;;  %v3946_v7 = vadd.f32 %v4560_v37, %v276_v1  ;;  %v4298_v17 = vld [vmem:[#allocation4 + $0x628] ss:$16 sps:$4 sm:$0xff]   ;;  %v4303_v18 = vld [vmem:[#allocation4 + $0x644] ss:$16 sps:$4 sm:$0xff]  }
 0x1c2   :  { %3248 = vmatprep.subr.bf16.mxu0 %v4243_v23  ;;  %3412 = vmatprep.subr.bf16.mxu1 %v4246_v26  ;;  %v1582_v39 = vpop.f32.mrb[7].mxu1  ;;  %v4301_v23 = vld [vmem:[#allocation4 + $0x640] ss:$16 sps:$4 sm:$0xff]   ;;  %v4304_v26 = vld [vmem:[#allocation4 + $0x648] ss:$16 sps:$4 sm:$0xff]  }
 0x1c3   :  { %3264 = vmatprep.mubr.bf16.mxu0 %v1589_v30  ;;  %3428 = vmatprep.mubr.bf16.mxu1 %v1589_v30  ;;  %v1591_v13 = vpack.c.bf16 %v3946_v7, %v3946_v7  ;;  %v4309_v27 = vld [vmem:[#allocation4 + $0x664] ss:$16 sps:$4 sm:$0xff]   ;;  %v4312_v28 = vld [vmem:[#allocation4 + $0x66c] ss:$16 sps:$4 sm:$0xff]   ;;  %v4307_v29 = vld [vmem:[#allocation4 + $0x660] ss:$16 sps:$4 sm:$0xff]  }
 0x1c4   :  { %v4310_v30 = vld [vmem:[#allocation4 + $0x668] ss:$16 sps:$4 sm:$0xff]   ;;  %v4321_v37 = vld [vmem:[#allocation4 + $0x6a4] ss:$16 sps:$4 sm:$0xff]   ;;  %v4324_v38 = vld [vmem:[#allocation4 + $0x6ac] ss:$16 sps:$4 sm:$0xff]  }
 0x1c5   :  { %3249 = vmatpush1.bf16.msra.mxu0 %v4241_v31  ;;  %3413 = vmatpush1.bf16.msra.mxu1 %v4244_v32  ;;  %v4315_v31 = vld [vmem:[#allocation4 + $0x684] ss:$16 sps:$4 sm:$0xff]   ;;  %v4318_v32 = vld [vmem:[#allocation4 + $0x68c] ss:$16 sps:$4 sm:$0xff]   ;;  %v4319_v39 = vld [vmem:[#allocation4 + $0x6a0] ss:$16 sps:$4 sm:$0xff]  }
 0x1c6   :  { %3250 = vmatprep.subr.bf16.mxu0 %v4249_v33  ;;  %3414 = vmatprep.subr.bf16.mxu1 %v4252_v34  ;;  %v4313_v33 = vld [vmem:[#allocation4 + $0x680] ss:$16 sps:$4 sm:$0xff]   ;;  %v4316_v34 = vld [vmem:[#allocation4 + $0x688] ss:$16 sps:$4 sm:$0xff]   ;;  %v4372_v4 = vld [vmem:[#allocation4 + $0x7ac] ss:$16 sps:$4 sm:$0xff]  }
 0x1c7   :  { %v4361_v1 = vld [vmem:[#allocation4 + $0x780] ss:$16 sps:$4 sm:$0xff]   ;;  %v4370_v7 = vld [vmem:[#allocation4 + $0x7a8] ss:$16 sps:$4 sm:$0xff]  }
 0x1c9   :  { %3251 = vmatpush1.bf16.msra.mxu0 %v4247_v40  ;;  %3415 = vmatpush1.bf16.msra.mxu1 %v4250_v41  ;;  %v4322_v40 = vld [vmem:[#allocation4 + $0x6a8] ss:$16 sps:$4 sm:$0xff]   ;;  %v4327_v41 = vld [vmem:[#allocation4 + $0x6c4] ss:$16 sps:$4 sm:$0xff]  }
 0x1ca   :  { %3252 = vmatprep.subr.bf16.mxu0 %v4255_v42  ;;  %3416 = vmatprep.subr.bf16.mxu1 %v4258_v43  ;;  %v4330_v42 = vld [vmem:[#allocation4 + $0x6cc] ss:$16 sps:$4 sm:$0xff]   ;;  %v4325_v43 = vld [vmem:[#allocation4 + $0x6c0] ss:$16 sps:$4 sm:$0xff]  }
 0x1cd   :  { %3253 = vmatpush1.bf16.msra.mxu0 %v4253_v44  ;;  %3417 = vmatpush1.bf16.msra.mxu1 %v4256_v45  ;;  %v4328_v44 = vld [vmem:[#allocation4 + $0x6c8] ss:$16 sps:$4 sm:$0xff]   ;;  %v4333_v45 = vld [vmem:[#allocation4 + $0x6e4] ss:$16 sps:$4 sm:$0xff]  }
 0x1ce   :  { %3254 = vmatprep.subr.bf16.mxu0 %v4261_v48  ;;  %3418 = vmatprep.subr.bf16.mxu1 %v4264_v10  ;;  %v4336_v48 = vld [vmem:[#allocation4 + $0x6ec] ss:$16 sps:$4 sm:$0xff]   ;;  %v4331_v10 = vld [vmem:[#allocation4 + $0x6e0] ss:$16 sps:$4 sm:$0xff]  }
 0x1d1   :  { %3255 = vmatpush1.bf16.msra.mxu0 %v4259_v49  ;;  %3419 = vmatpush1.bf16.msra.mxu1 %v4262_v50  ;;  %v4334_v49 = vld [vmem:[#allocation4 + $0x6e8] ss:$16 sps:$4 sm:$0xff]   ;;  %v4339_v50 = vld [vmem:[#allocation4 + $0x704] ss:$16 sps:$4 sm:$0xff]  }
 0x1d2   :  { %3256 = vmatprep.subr.bf16.mxu0 %v4267_v51  ;;  %3420 = vmatprep.subr.bf16.mxu1 %v4270_v52  ;;  %v4342_v51 = vld [vmem:[#allocation4 + $0x70c] ss:$16 sps:$4 sm:$0xff]   ;;  %v4337_v52 = vld [vmem:[#allocation4 + $0x700] ss:$16 sps:$4 sm:$0xff]  }
 0x1d5   :  { %3257 = vmatpush1.bf16.msra.mxu0 %v4265_v53  ;;  %3421 = vmatpush1.bf16.msra.mxu1 %v4268_v47  ;;  %v4340_v53 = vld [vmem:[#allocation4 + $0x708] ss:$16 sps:$4 sm:$0xff]   ;;  %v4345_v47 = vld [vmem:[#allocation4 + $0x724] ss:$16 sps:$4 sm:$0xff]  }
 0x1d6   :  { %3258 = vmatprep.subr.bf16.mxu0 %v4273_v54  ;;  %3422 = vmatprep.subr.bf16.mxu1 %v4276_v55  ;;  %v4348_v54 = vld [vmem:[#allocation4 + $0x72c] ss:$16 sps:$4 sm:$0xff]   ;;  %v4343_v55 = vld [vmem:[#allocation4 + $0x720] ss:$16 sps:$4 sm:$0xff]  }
 0x1d9   :  { %3259 = vmatpush1.bf16.msra.mxu0 %v4271_v35  ;;  %3423 = vmatpush1.bf16.msra.mxu1 %v4274_v56  ;;  %v4346_v35 = vld [vmem:[#allocation4 + $0x728] ss:$16 sps:$4 sm:$0xff]   ;;  %v4351_v56 = vld [vmem:[#allocation4 + $0x744] ss:$16 sps:$4 sm:$0xff]  }
 0x1da   :  { %3260 = vmatprep.subr.bf16.mxu0 %v4279_v57  ;;  %3424 = vmatprep.subr.bf16.mxu1 %v4282_v58  ;;  %v4349_v57 = vld [vmem:[#allocation4 + $0x740] ss:$16 sps:$4 sm:$0xff]   ;;  %v4352_v58 = vld [vmem:[#allocation4 + $0x748] ss:$16 sps:$4 sm:$0xff]  }
 0x1dd   :  { %3261 = vmatpush1.bf16.msra.mxu0 %v4277_v60  ;;  %3425 = vmatpush1.bf16.msra.mxu1 %v4280_v61  ;;  %v4360_v60 = vld [vmem:[#allocation4 + $0x76c] ss:$16 sps:$4 sm:$0xff]   ;;  %v4355_v61 = vld [vmem:[#allocation4 + $0x760] ss:$16 sps:$4 sm:$0xff]  }
 0x1de   :  { %3262 = vmatprep.subr.bf16.mxu0 %v4285_v63  ;;  %3426 = vmatprep.subr.bf16.mxu1 %v4288_v0  ;;  %v4363_v63 = vld [vmem:[#allocation4 + $0x784] ss:$16 sps:$4 sm:$0xff]   ;;  %v4366_v0 = vld [vmem:[#allocation4 + $0x78c] ss:$16 sps:$4 sm:$0xff]  }
 0x1e1   :  { %3263 = vmatpush1.bf16.msra.mxu0 %v4283_v2  ;;  %3427 = vmatpush1.bf16.msra.mxu1 %v4286_v3  ;;  %v4364_v2 = vld [vmem:[#allocation4 + $0x788] ss:$16 sps:$4 sm:$0xff]   ;;  %v4369_v3 = vld [vmem:[#allocation4 + $0x7a4] ss:$16 sps:$4 sm:$0xff]  }
 0x1e2   :  { %3273 = vmatprep.subr.bf16.mxu0 %v4291_v5  ;;  %3437 = vmatprep.subr.bf16.mxu1 %v4294_v6  ;;  %v4367_v5 = vld [vmem:[#allocation4 + $0x7a0] ss:$16 sps:$4 sm:$0xff]   ;;  %v271_v6 = vsub.s32 6, %v4528_v19 }
 0x1e4   :  { %3265 = vmatmul.mubr.bf16.vlgmr.msra.gmra.mrb[8].mxu0 %v1588_v9  ;;  %3429 = vmatmul.mubr.bf16.vlgmr.msra.gmra.mrb[8].mxu1 %v1588_v9  ;;  %v4378_v9 = vld [vmem:[#allocation4 + $0x7cc] ss:$16 sps:$4 sm:$0xff]  }
 0x1e5   :  { %3274 = vmatpush1.bf16.msra.mxu0 %v4289_v8  ;;  %3305 = vmatprep.mubr.bf16.mxu0 %v1591_v13  ;;  %v4375_v8 = vld [vmem:[#allocation4 + $0x7c4] ss:$16 sps:$4 sm:$0xff]  }
 0x1e6   :  { %3438 = vmatpush1.bf16.msra.mxu1 %v4292_v12  ;;  %3469 = vmatprep.mubr.bf16.mxu1 %v1591_v13  ;;  %v4373_v12 = vld [vmem:[#allocation4 + $0x7c0] ss:$16 sps:$4 sm:$0xff]   ;;  %v272_v13 = vrot.slane %v4534_v46, %v271_v6 }
 0x1e7   :  { %3275 = vmatprep.subr.bf16.mxu0 %v4297_v14  ;;  %3439 = vmatprep.subr.bf16.mxu1 %v4300_v15  ;;  %v4376_v14 = vld [vmem:[#allocation4 + $0x7c8] ss:$16 sps:$4 sm:$0xff]   ;;  %v4381_v15 = vld [vmem:[#allocation4 + $0x7e4] ss:$16 sps:$4 sm:$0xff]   ;;  %v1848_v46 = vld [vmem:[%s4598_s4] sm:$0xf] }
 0x1e9   :  { %3276 = vmatpush1.bf16.msra.mxu0 %v4295_v16  ;;  %v4384_v16 = vld [vmem:[#allocation4 + $0x7ec] ss:$16 sps:$4 sm:$0xff]  }
 0x1ea   :  { %3440 = vmatpush1.bf16.msra.mxu1 %v4298_v17  ;;  %3277 = vmatprep.subr.bf16.mxu0 %v4303_v18  ;;  %v4379_v17 = vld [vmem:[#allocation4 + $0x7e0] ss:$16 sps:$4 sm:$0xff]   ;;  %v3945_v18 = vadd.f32 %v4558_v11, %v272_v13  ;;  %v1857_v11 = vrot.slane %v1848_v46, %v251_v21 }
 0x1eb   :  { %3441 = vmatprep.subr.bf16.mxu1 %v4306_v22  ;;  %v4382_v22 = vld [vmem:[#allocation4 + $0x7e8] ss:$16 sps:$4 sm:$0xff]  }
 0x1ed   :  { %3278 = vmatpush1.bf16.msra.mxu0 %v4301_v23  ;;  %v1590_v23 = vpack.c.bf16 %v3945_v18, %v3945_v18 }
 0x1ee   :  { %3442 = vmatpush1.bf16.msra.mxu1 %v4304_v26  ;;  %3279 = vmatprep.subr.bf16.mxu0 %v4309_v27  ;;  %v1853_v26 = vrot.slane %v1848_v46, %v247_v20  ;;  %v1861_v27 = vrot.slane %v1848_v46, %v255_v36 }
 0x1ef   :  { %3443 = vmatprep.subr.bf16.mxu1 %v4312_v28  ;;  %v1865_v28 = vrot.slane %v1848_v46, %v259_v24 }
 0x1f1   :  { %3280 = vmatpush1.bf16.msra.mxu0 %v4307_v29 }
 0x1f2   :  { %3444 = vmatpush1.bf16.msra.mxu1 %v4310_v30  ;;  %3281 = vmatprep.subr.bf16.mxu0 %v4315_v31 }
 0x1f3   :  { %3445 = vmatprep.subr.bf16.mxu1 %v4318_v32 }
 0x1f5   :  { %3282 = vmatpush1.bf16.msra.mxu0 %v4313_v33 }
 0x1f6   :  { %3446 = vmatpush1.bf16.msra.mxu1 %v4316_v34  ;;  %3283 = vmatprep.subr.bf16.mxu0 %v4321_v37 }
 0x1f7   :  { %3447 = vmatprep.subr.bf16.mxu1 %v4324_v38 }
 0x1f9   :  { %3284 = vmatpush1.bf16.msra.mxu0 %v4319_v39 }
 0x1fa   :  { %3448 = vmatpush1.bf16.msra.mxu1 %v4322_v40  ;;  %3285 = vmatprep.subr.bf16.mxu0 %v4327_v41 }
 0x1fb   :  { %3449 = vmatprep.subr.bf16.mxu1 %v4330_v42 }
 0x1fd   :  { %3286 = vmatpush1.bf16.msra.mxu0 %v4325_v43 }
 0x1fe   :  { %3450 = vmatpush1.bf16.msra.mxu1 %v4328_v44  ;;  %3287 = vmatprep.subr.bf16.mxu0 %v4333_v45 }
 0x1ff   :  { %3451 = vmatprep.subr.bf16.mxu1 %v4336_v48 }
 0x201   :  { %3288 = vmatpush1.bf16.msra.mxu0 %v4331_v10 }
 0x202   :  { %3452 = vmatpush1.bf16.msra.mxu1 %v4334_v49  ;;  %3289 = vmatprep.subr.bf16.mxu0 %v4339_v50 }
 0x203   :  { %3453 = vmatprep.subr.bf16.mxu1 %v4342_v51 }
 0x205   :  { %3290 = vmatpush1.bf16.msra.mxu0 %v4337_v52 }
 0x206   :  { %3454 = vmatpush1.bf16.msra.mxu1 %v4340_v53  ;;  %3291 = vmatprep.subr.bf16.mxu0 %v4345_v47 }
 0x207   :  { %3455 = vmatprep.subr.bf16.mxu1 %v4348_v54 }
 0x209   :  { %3292 = vmatpush1.bf16.msra.mxu0 %v4343_v55 }
 0x20a   :  { %3456 = vmatpush1.bf16.msra.mxu1 %v4346_v35  ;;  %3293 = vmatprep.subr.bf16.mxu0 %v4351_v56 }
 0x20b   :  { %3457 = vmatprep.subr.bf16.mxu1 %v4354_v25 }
 0x20d   :  { %3294 = vmatpush1.bf16.msra.mxu0 %v4349_v57 }
 0x20e   :  { %3458 = vmatpush1.bf16.msra.mxu1 %v4352_v58  ;;  %3295 = vmatprep.subr.bf16.mxu0 %v4357_v59 }
 0x20f   :  { %3459 = vmatprep.subr.bf16.mxu1 %v4360_v60 }
 0x211   :  { %3296 = vmatpush1.bf16.msra.mxu0 %v4355_v61 }
 0x212   :  { %3460 = vmatpush1.bf16.msra.mxu1 %v4358_v62  ;;  %3297 = vmatprep.subr.bf16.mxu0 %v4363_v63 }
 0x213   :  { %3461 = vmatprep.subr.bf16.mxu1 %v4366_v0 }
 0x215   :  { %3298 = vmatpush1.bf16.msra.mxu0 %v4361_v1 }
 0x216   :  { %3462 = vmatpush1.bf16.msra.mxu1 %v4364_v2  ;;  %3299 = vmatprep.subr.bf16.mxu0 %v4369_v3 }
 0x217   :  { %3463 = vmatprep.subr.bf16.mxu1 %v4372_v4 }
 0x219   :  { %3300 = vmatpush1.bf16.msra.mxu0 %v4367_v5 }
 0x21a   :  { %3464 = vmatpush1.bf16.msra.mxu1 %v4370_v7  ;;  %3301 = vmatprep.subr.bf16.mxu0 %v4375_v8 }
 0x21b   :  { %3465 = vmatprep.subr.bf16.mxu1 %v4378_v9 }
 0x21d   :  { %3302 = vmatpush1.bf16.msra.mxu0 %v4373_v12 }
 0x21e   :  { %3466 = vmatpush1.bf16.msra.mxu1 %v4376_v14  ;;  %3303 = vmatprep.subr.bf16.mxu0 %v4381_v15 }
 0x21f   :  { %3467 = vmatprep.subr.bf16.mxu1 %v4384_v16 }
 0x221   :  { %3304 = vmatpush1.bf16.msra.mxu0 %v4379_v17 }
 0x222   :  { %3468 = vmatpush1.bf16.msra.mxu1 %v4382_v22 }
 0x224   :  { %3306 = vmatmul.mubr.bf16.vlgmr.msra.gmra.mrb[8].mxu0 %v1590_v23 }
 0x225   :  { %3470 = vmatmul.mubr.bf16.vlgmr.msra.gmra.mrb[8].mxu1 %v1590_v23 }
 0x2f7   :  { %v3307_v29 = vpop.f32.mrb[8].mxu0 }
 0x2f8   :  { %v3947_v30 = vadd.f32 %v3307_v29, %v1853_v26  ;;  %v3471_v31 = vpop.f32.mrb[8].mxu1  ;;  %v3309_v32 = vpop.f32.mrb[9].mxu0 }
 0x2f9   :  { %v3949_v33 = vadd.f32 %v3471_v31, %v1861_v27  ;;  %v3948_v34 = vadd.f32 %v3309_v32, %v1857_v11  ;;  %v3473_v37 = vpop.f32.mrb[9].mxu1  ;;  %v3311_v38 = vpop.f32.mrb[10].mxu0 }
 0x2fa   :  { %3478 = vst [vmem:[%s4599_s5] sm:$0xff] %v3947_v30  ;;  %v3950_v20 = vadd.f32 %v3473_v37, %v1865_v28  ;;  %v3475_v36 = vpop.f32.mrb[10].mxu1  ;;  %v3312_v39 = vpop.f32.mrb[11].mxu0 }
 0x2fb   :  { %3480 = vst [vmem:[%s4599_s5 + $0x10] sm:$0xff] %v3949_v33  ;;  %3479 = vst [vmem:[%s4599_s5 + $0x8] sm:$0xff] %v3948_v34  ;;  %v3476_v19 = vpop.f32.mrb[11].mxu1 }
 0x2fc   :  { %3481 = vst [vmem:[%s4599_s5 + $0x18] sm:$0xff] %v3950_v20 }
 0x2fd   :  { %3486 = vsyncpa [#allocation3], 1 }
 0x2fe   :  { %3487 = vsyncpa [#allocation5], 1 }

</bundles_post_ra>
